<compile_context>
chip_gen: v7x
topology: tpu7x:2x2x1
jax: 0.10.0
libtpu: 0.0.40
codegen_flags: <defaults>
</compile_context>

<pallas_src>
import functools

import jax
import jax.numpy as jnp
import numpy as np
from jax import lax
from jax.experimental import pallas as pl
from jax.experimental.pallas import tpu as pltpu


def _round_up(a, b):
    return -(-a // b) * b


# --------------------------- shared conv helper ------------------------------
def _relu_dw_pw(x_ref, dw_ref, pw_ref, *, K, stride, W1r):
    """ReLU -> depthwise (1,K) conv (stride along W) -> block-diag 1x1 MXU matmul.

    Returns (TB, W1r, lanes_out) f32.  Columns >= W1 (alignment padding) may
    hold partial-window garbage; callers mask them where it matters."""
    TB, Wx, GCi = x_ref.shape
    acc = jnp.zeros((TB, W1r, GCi), jnp.float32)
    if stride == 1:
        x = jnp.maximum(x_ref[...], 0.0)                  # ReLU once per block
        for k in range(K):
            acc = acc + x[:, k:k + W1r, :] * dw_ref[k:k + 1, :][None]
    else:
        for k in range(K):
            xs = jnp.maximum(x_ref[:, pl.ds(k, W1r, stride=stride), :], 0.0)
            acc = acc + xs * dw_ref[k:k + 1, :][None]
    # reshape is tile-aligned because W1r % 8 == 0
    z = jnp.dot(acc.reshape(TB * W1r, GCi), pw_ref[...],
                preferred_element_type=jnp.float32)
    return z.reshape(TB, W1r, pw_ref.shape[1])


# --------------------------- stage 1 kernel ----------------------------------
# ReLU -> dw1 -> pw1 -> per-tile BN1 partial stats (no activation written).
def _stage1_kernel(x_ref, dw_ref, pw_ref, st_ref, *, K, stride, W1, W1r):
    z = _relu_dw_pw(x_ref, dw_ref, pw_ref, K=K, stride=stride, W1r=W1r)
    TB, _, GC = z.shape
    if W1r != W1:                       # drop alignment-garbage columns
        col = lax.broadcasted_iota(jnp.int32, (1, W1r, GC), 1)
        z = jnp.where(col < W1, z, 0.0)
    zf = z.reshape(TB * W1r, GC)
    s = jnp.sum(zf, axis=0, keepdims=True)
    q = jnp.sum(zf * zf, axis=0, keepdims=True)
    st_ref[...] = jnp.concatenate([s, q], axis=0)[None]


# --------------------------- stage 2 kernel ----------------------------------
# Recompute ReLU->dw1->pw1, apply BN1 affine + ReLU (masking pad lanes /
# alignment columns), dw2 -> pw2, write z2 + per-tile BN2 partial stats.
def _stage2_kernel(x_ref, mask_ref, sc_ref, sh_ref, dw1_ref, pw1_ref,
                   dw2_ref, pw2_ref, z2_ref, st_ref, *,
                   K, stride, pad, W1, W1r, W2, W2r):
    TB, _, GCi = x_ref.shape
    GCo = z2_ref.shape[2]

    z1 = _relu_dw_pw(x_ref, dw1_ref, pw1_ref, K=K, stride=stride, W1r=W1r)

    # BN1 affine + ReLU
    h = jnp.maximum(z1 * sc_ref[...][None] + sh_ref[...][None], 0.0)
    if W1r != W1:                       # ReLU(sh1) != 0 on alignment columns
        col1 = lax.broadcasted_iota(jnp.int32, (1, W1r, GCi), 1)
        h = jnp.where(col1 < W1, h, 0.0)
    h = h * mask_ref[...]               # zero batch-padding lane groups

    # zero-pad along W for the second depthwise conv (stride 1, padding=pad)
    Whp = max(2 * pad + W1r, W2r + K - 1)
    parts = []
    if pad > 0:
        parts.append(jnp.zeros((TB, pad, GCi), h.dtype))
    parts.append(h)
    rpad = Whp - pad - W1r
    if rpad > 0:
        parts.append(jnp.zeros((TB, rpad, GCi), h.dtype))
    hp = jnp.concatenate(parts, axis=1) if len(parts) > 1 else parts[0]

    acc = jnp.zeros((TB, W2r, GCi), jnp.float32)
    for k in range(K):
        acc = acc + hp[:, k:k + W2r, :] * dw2_ref[k:k + 1, :][None]
    z2 = jnp.dot(acc.reshape(TB * W2r, GCi), pw2_ref[...],
                 preferred_element_type=jnp.float32).reshape(TB, W2r, GCo)
    if W2r != W2:                       # alignment columns hold partial windows
        col2 = lax.broadcasted_iota(jnp.int32, (1, W2r, GCo), 1)
        z2 = jnp.where(col2 < W2, z2, 0.0)

    zf = z2.reshape(TB * W2r, GCo)
    s = jnp.sum(zf, axis=0, keepdims=True)
    q = jnp.sum(zf * zf, axis=0, keepdims=True)
    st_ref[...] = jnp.concatenate([s, q], axis=0)[None]
    z2_ref[...] = z2.astype(z2_ref.dtype)


# ------------------------------- wrapper --------------------------------------
def _scoped_vmem_limit_bytes():
    """Per-generation scoped-VMEM budget: ~3/4 of physical, capped at 96 MiB
    (v5e/v6e: 128 MiB -> 96 MiB; v7x: 64 MiB -> 48 MiB)."""
    cap = None
    try:
        cap = getattr(pltpu.get_tpu_info(), "vmem_capacity_bytes", None)
    except Exception:
        cap = None
    if not cap:
        cap = 64 * 1024 * 1024          # v7x-safe fallback
    return int(min(int(cap) * 3 // 4, 96 * 1024 * 1024))


def sepconv_freq(x, params, *, kernel_size, stride, padding, eps=1e-5):
    """x: (N, C_in, H, W) float32, NCHW (PyTorch convention)."""
    dw1, pw1, g1, b1, dw2, pw2, g2, b2 = params
    N, C_in, H, W = x.shape
    C_out = pw2.shape[0]
    K, pad = kernel_size, padding
    f32 = jnp.float32

    # (1,K) kernel + zero H-padding + stride == plain row subsampling along H
    xh = x[:, :, ::stride, :]
    Hh = xh.shape[2]
    B = N * Hh

    W1 = (W + 2 * pad - K) // stride + 1
    W2 = W1 + 2 * pad - K + 1
    W1r = _round_up(W1, 8)              # sublane-aligned conv widths so the
    W2r = _round_up(W2, 8)              # (TB,W,128)->(TB*W,128) reshapes are free
    Wx = max(W + 2 * pad, K + stride * (W1r - 1))   # packed x width (extra zeros)
    Whp = max(2 * pad + W1r, W2r + K - 1)

    # ---- lane packing: G row-groups share the 128-lane axis ----
    G = max(1, 128 // C_in)
    GCi, GCo = G * C_in, G * C_out
    Bg0 = -(-B // G)                                    # packed rows (ceil)

    # ---- batch-tile sizing: fill the per-generation VMEM budget ----
    vmem_limit = _scoped_vmem_limit_bytes()
    row_io = 4 * (Wx * GCi + W2r * GCo + GCi)           # streamed blocks / row
    row_tmp = 4 * (2 * Wx * GCi + 3 * W1r * GCi + Whp * GCi
                   + W2r * GCi + 2 * W2r * GCo)         # live temporaries / row
    row_bytes = 2 * row_io + row_tmp                    # 2x for double-buffering
    w_bytes = 8 * (2 * K * GCi + GCi * GCi + GCi * GCo + 4 * GCi)
    budget = max(row_bytes, (vmem_limit * 3) // 4 - w_bytes)
    TBg = int(max(1, min(budget // row_bytes, Bg0)))
    if Bg0 >= 2:                                        # keep >= 2 tiles so v7x
        TBg = min(TBg, -(-Bg0 // 2))                    # megacore uses both TCs
    n_tiles = -(-Bg0 // TBg)
    Bg = n_tiles * TBg
    Bp = Bg * G

    # NCHW -> (B, W, C) -> pad rows/W -> pack G rows into lanes: (Bg, Wx, G*C)
    xb = jnp.transpose(xh, (0, 2, 3, 1)).reshape(B, W, C_in)
    xb = jnp.pad(xb, ((0, Bp - B), (pad, Wx - pad - W), (0, 0)))
    xp = xb.reshape(Bg, G, Wx, C_in).transpose(0, 2, 1, 3).reshape(Bg, Wx, GCi)

    # weight re-layout: tiled depthwise vectors, block-diagonal pointwise mats
    dw1_l = jnp.tile(jnp.transpose(dw1[:, 0, 0, :]), (1, G)).astype(f32)
    dw2_l = jnp.tile(jnp.transpose(dw2[:, 0, 0, :]), (1, G)).astype(f32)
    pw1_bd = jnp.kron(jnp.eye(G, dtype=f32),
                      jnp.transpose(pw1[:, :, 0, 0]).astype(f32))
    pw2_bd = jnp.kron(jnp.eye(G, dtype=f32),
                      jnp.transpose(pw2[:, :, 0, 0]).astype(f32))

    # per-lane validity of packed batch rows (zeros on batch padding)
    r_idx = jnp.arange(Bg)[:, None]
    g_idx = jnp.repeat(jnp.arange(G), C_in)[None, :]
    row_mask = ((r_idx * G + g_idx) < B).astype(f32)[:, None, :]     # (Bg,1,GCi)

    cparams = pltpu.CompilerParams(dimension_semantics=("parallel",),
                                   vmem_limit_bytes=vmem_limit)

    # ---- stage 1: BN1 partial stats only (activations recomputed in stage 2)
    st1 = pl.pallas_call(
        functools.partial(_stage1_kernel, K=K, stride=stride, W1=W1, W1r=W1r),
        grid=(n_tiles,),
        in_specs=[pl.BlockSpec((TBg, Wx, GCi), lambda i: (i, 0, 0)),
                  pl.BlockSpec((K, GCi), lambda i: (0, 0)),
                  pl.BlockSpec((GCi, GCi), lambda i: (0, 0))],
        out_specs=pl.BlockSpec((1, 2, GCi), lambda i: (i, 0, 0)),
        out_shape=jax.ShapeDtypeStruct((n_tiles, 2, GCi), f32),
        compiler_params=cparams,
    )(xp, dw1_l, pw1_bd)

    # ---- BN1 finalize (tiny per-channel scalar math in plain JAX) ----
    cnt1 = float(B * W1)
    s1 = st1[:, 0, :].sum(0).reshape(G, C_in).sum(0)
    q1 = st1[:, 1, :].sum(0).reshape(G, C_in).sum(0)
    m1 = s1 / cnt1
    v1 = jnp.maximum(q1 / cnt1 - m1 * m1, 0.0)
    sc1 = g1 * lax.rsqrt(v1 + eps)
    sh1 = b1 - m1 * sc1
    sc1_l = jnp.tile(sc1, G).reshape(1, GCi).astype(f32)
    sh1_l = jnp.tile(sh1, G).reshape(1, GCi).astype(f32)

    # ---- stage 2: recompute + BN1 affine/ReLU + dw2 + pw2 + BN2 stats ----
    z2p, st2 = pl.pallas_call(
        functools.partial(_stage2_kernel, K=K, stride=stride, pad=pad,
                          W1=W1, W1r=W1r, W2=W2, W2r=W2r),
        grid=(n_tiles,),
        in_specs=[pl.BlockSpec((TBg, Wx, GCi), lambda i: (i, 0, 0)),
                  pl.BlockSpec((TBg, 1, GCi), lambda i: (i, 0, 0)),
                  pl.BlockSpec((1, GCi), lambda i: (0, 0)),
                  pl.BlockSpec((1, GCi), lambda i: (0, 0)),
                  pl.BlockSpec((K, GCi), lambda i: (0, 0)),
                  pl.BlockSpec((GCi, GCi), lambda i: (0, 0)),
                  pl.BlockSpec((K, GCi), lambda i: (0, 0)),
                  pl.BlockSpec((GCi, GCo), lambda i: (0, 0))],
        out_specs=[pl.BlockSpec((TBg, W2r, GCo), lambda i: (i, 0, 0)),
                   pl.BlockSpec((1, 2, GCo), lambda i: (i, 0, 0))],
        out_shape=[jax.ShapeDtypeStruct((Bg, W2r, GCo), f32),
                   jax.ShapeDtypeStruct((n_tiles, 2, GCo), f32)],
        compiler_params=cparams,
    )(xp, row_mask, sc1_l, sh1_l, dw1_l, pw1_bd, dw2_l, pw2_bd)

    # ---- BN2 finalize ----
    cnt2 = float(B * W2)
    s2 = st2[:, 0, :].sum(0).reshape(G, C_out).sum(0)
    q2 = st2[:, 1, :].sum(0).reshape(G, C_out).sum(0)
    m2 = s2 / cnt2
    v2 = jnp.maximum(q2 / cnt2 - m2 * m2, 0.0)
    sc2 = g2 * lax.rsqrt(v2 + eps)
    sh2 = b2 - m2 * sc2

    # ---- unpack lanes -> rows; BN2 affine fused into the relayout copy ----
    y = z2p.reshape(Bg, W2r, G, C_out).transpose(0, 2, 1, 3).reshape(Bp, W2r, C_out)
    y = y[:B, :W2, :] * sc2[None, None, :] + sh2[None, None, :]
    out = y.reshape(N, Hh, W2, C_out).transpose(0, 3, 1, 2)
    return out.astype(x.dtype)


# ---------------- pure-JAX reference (mirrors torch semantics) ----------------
def _bn_ref(h, g, b, eps):
    m = h.mean(axis=(0, 2, 3), keepdims=True)
    v = ((h - m) ** 2).mean(axis=(0, 2, 3), keepdims=True)
    return (h - m) * lax.rsqrt(v + eps) * g.reshape(1, -1, 1, 1) + b.reshape(1, -1, 1, 1)


def sepconv_freq_ref(x, params, *, kernel_size, stride, padding, eps=1e-5):
    dw1, pw1, g1, b1, dw2, pw2, g2, b2 = params
    dn = ('NCHW', 'OIHW', 'NCHW')
    c_in = x.shape[1]
    h = jnp.maximum(x, 0.0)
    h = lax.conv_general_dilated(h, dw1, (stride, stride),
                                 ((0, 0), (padding, padding)),
                                 feature_group_count=c_in, dimension_numbers=dn)
    h = lax.conv_general_dilated(h, pw1, (1, 1), ((0, 0), (0, 0)),
                                 dimension_numbers=dn)
    h = _bn_ref(h, g1, b1, eps)
    h = jnp.maximum(h, 0.0)
    h = lax.conv_general_dilated(h, dw2, (1, 1), ((0, 0), (padding, padding)),
                                 feature_group_count=c_in, dimension_numbers=dn)
    h = lax.conv_general_dilated(h, pw2, (1, 1), ((0, 0), (0, 0)),
                                 dimension_numbers=dn)
    return _bn_ref(h, g2, b2, eps)


if __name__ == "__main__":
    key = jax.random.PRNGKey(0)
    N, C_in, C_out, H, W = 2, 4, 8, 8, 16
    K, stride, pad = 3, 1, 1

    ks = jax.random.split(key, 9)
    x = jax.random.normal(ks[0], (N, C_in, H, W), jnp.float32)
    dw1 = 0.3 * jax.random.normal(ks[1], (C_in, 1, 1, K), jnp.float32)
    pw1 = 0.3 * jax.random.normal(ks[2], (C_in, C_in, 1, 1), jnp.float32)
    g1 = 1.0 + 0.1 * jax.random.normal(ks[3], (C_in,), jnp.float32)
    b1 = 0.1 * jax.random.normal(ks[4], (C_in,), jnp.float32)
    dw2 = 0.3 * jax.random.normal(ks[5], (C_in, 1, 1, K), jnp.float32)
    pw2 = 0.3 * jax.random.normal(ks[6], (C_out, C_in, 1, 1), jnp.float32)
    g2 = 1.0 + 0.1 * jax.random.normal(ks[7], (C_out,), jnp.float32)
    b2 = 0.1 * jax.random.normal(ks[8], (C_out,), jnp.float32)
    params = (dw1, pw1, g1, b1, dw2, pw2, g2, b2)

    fwd = jax.jit(functools.partial(sepconv_freq, kernel_size=K,
                                    stride=stride, padding=pad))
    out = jax.block_until_ready(fwd(x, params))

    ref = sepconv_freq_ref(x, params, kernel_size=K, stride=stride, padding=pad)
    assert out.shape == ref.shape, (out.shape, ref.shape)
    np.testing.assert_allclose(np.asarray(out), np.asarray(ref),
                               atol=3e-4, rtol=3e-4)
    print("KERNEL_OK")
</pallas_src>

<mosaic_0001>
module attributes {stable_mosaic.version = 11 : i64} {
  func.func @_stage1_kernel(%arg0: i32, %arg1: memref<1x18x128xf32, #tpu.memory_space<vmem>>, %arg2: memref<3x128xf32, #tpu.memory_space<vmem>>, %arg3: memref<128x128xf32, #tpu.memory_space<vmem>>, %arg4: memref<1x2x128xf32, #tpu.memory_space<vmem>>) attributes {dimension_semantics = [#tpu.dimension_semantics<parallel>], iteration_bounds = array<i64: 1>, scalar_prefetch = 0 : i64, scratch_operands = 0 : i64, tpu.core_type = #tpu.core_type<tc>, window_params = [{transform_indices = @transform_0, window_bounds = array<i64: 1, 18, 128>}, {pipeline_mode = #tpu.pipeline_mode<synchronous>, transform_indices = @transform_1, window_bounds = array<i64: 3, 128>}, {pipeline_mode = #tpu.pipeline_mode<synchronous>, transform_indices = @transform_2, window_bounds = array<i64: 128, 128>}, {transform_indices = @transform_3, window_bounds = array<i64: 1, 2, 128>}]} {
    %cst = arith.constant 0.000000e+00 : f32
    %0 = vector.broadcast %cst : f32 to vector<1x16x128xf32>
    %c0 = arith.constant 0 : index
    %c0_0 = arith.constant 0 : index
    %c0_1 = arith.constant 0 : index
    %1 = vector.load %arg1[%c0, %c0_0, %c0_1] : memref<1x18x128xf32, #tpu.memory_space<vmem>>, vector<1x18x128xf32>
    %cst_2 = arith.constant 0.000000e+00 : f32
    %2 = vector.broadcast %cst_2 : f32 to vector<1x18x128xf32>
    %3 = arith.maximumf %1, %2 : vector<1x18x128xf32>
    %4 = vector.extract_strided_slice %3 {offsets = [0, 0, 0], sizes = [1, 16, 128], strides = [1, 1, 1]} : vector<1x18x128xf32> to vector<1x16x128xf32>
    %c0_3 = arith.constant 0 : index
    %c0_4 = arith.constant 0 : index
    %5 = vector.load %arg2[%c0_3, %c0_4] : memref<3x128xf32, #tpu.memory_space<vmem>>, vector<1x128xf32>
    %6 = vector.shape_cast %5 : vector<1x128xf32> to vector<1x1x128xf32>
    %7 = vector.broadcast %6 : vector<1x1x128xf32> to vector<1x16x128xf32>
    %8 = arith.mulf %4, %7 : vector<1x16x128xf32>
    %9 = arith.addf %0, %8 : vector<1x16x128xf32>
    %10 = vector.extract_strided_slice %3 {offsets = [0, 1, 0], sizes = [1, 16, 128], strides = [1, 1, 1]} : vector<1x18x128xf32> to vector<1x16x128xf32>
    %c1 = arith.constant 1 : index
    %c0_5 = arith.constant 0 : index
    %11 = vector.load %arg2[%c1, %c0_5] : memref<3x128xf32, #tpu.memory_space<vmem>>, vector<1x128xf32>
    %12 = vector.shape_cast %11 : vector<1x128xf32> to vector<1x1x128xf32>
    %13 = vector.broadcast %12 : vector<1x1x128xf32> to vector<1x16x128xf32>
    %14 = arith.mulf %10, %13 : vector<1x16x128xf32>
    %15 = arith.addf %9, %14 : vector<1x16x128xf32>
    %16 = vector.extract_strided_slice %3 {offsets = [0, 2, 0], sizes = [1, 16, 128], strides = [1, 1, 1]} : vector<1x18x128xf32> to vector<1x16x128xf32>
    %c2 = arith.constant 2 : index
    %c0_6 = arith.constant 0 : index
    %17 = vector.load %arg2[%c2, %c0_6] : memref<3x128xf32, #tpu.memory_space<vmem>>, vector<1x128xf32>
    %18 = vector.shape_cast %17 : vector<1x128xf32> to vector<1x1x128xf32>
    %19 = vector.broadcast %18 : vector<1x1x128xf32> to vector<1x16x128xf32>
    %20 = arith.mulf %16, %19 : vector<1x16x128xf32>
    %21 = arith.addf %15, %20 : vector<1x16x128xf32>
    %22 = vector.shape_cast %21 : vector<1x16x128xf32> to vector<16x128xf32>
    %c0_7 = arith.constant 0 : index
    %c0_8 = arith.constant 0 : index
    %23 = vector.load %arg3[%c0_7, %c0_8] : memref<128x128xf32, #tpu.memory_space<vmem>>, vector<128x128xf32>
    %cst_9 = arith.constant dense<0.000000e+00> : vector<16x128xf32>
    %24 = tpu.matmul %22, %23, %cst_9 {dimension_numbers = #tpu.dot_dimension_numbers<[1], [0], [0], [1], [0, 0, 1, 1], [], []>} : vector<16x128xf32>, vector<128x128xf32>, vector<16x128xf32> -> vector<16x128xf32>
    %25 = vector.shape_cast %24 : vector<16x128xf32> to vector<1x16x128xf32>
    %26 = vector.shape_cast %25 : vector<1x16x128xf32> to vector<16x128xf32>
    %cst_10 = arith.constant dense<0.000000e+00> : vector<128xf32>
    %27 = vector.multi_reduction <add>, %26, %cst_10 [0] : vector<16x128xf32> to vector<128xf32>
    %28 = vector.shape_cast %27 : vector<128xf32> to vector<1x128xf32>
    %29 = arith.mulf %26, %26 : vector<16x128xf32>
    %cst_11 = arith.constant dense<0.000000e+00> : vector<128xf32>
    %30 = vector.multi_reduction <add>, %29, %cst_11 [0] : vector<16x128xf32> to vector<128xf32>
    %31 = vector.shape_cast %30 : vector<128xf32> to vector<1x128xf32>
    %32 = tpu.concatenate %28, %31 in 0 : vector<1x128xf32>, vector<1x128xf32> -> vector<2x128xf32>
    %33 = vector.shape_cast %32 : vector<2x128xf32> to vector<1x2x128xf32>
    %c0_12 = arith.constant 0 : index
    %c0_13 = arith.constant 0 : index
    %c0_14 = arith.constant 0 : index
    %34 = vector.load %arg4[%c0_12, %c0_13, %c0_14] : memref<1x2x128xf32, #tpu.memory_space<vmem>>, vector<1x2x128xf32>
    tpu.vector_store %arg4[%c0_12, %c0_13, %c0_14], %33 {strides = array<i32>} : memref<1x2x128xf32, #tpu.memory_space<vmem>>, vector<1x2x128xf32>,
    return
  }
  func.func @transform_0(%arg0: i32) -> (i32, i32, i32) {
    %c0_i32 = arith.constant 0 : i32
    %c0_i32_0 = arith.constant 0 : i32
    %c0_i32_1 = arith.constant 0 : i32
    return %arg0, %c0_i32, %c0_i32_0 : i32, i32, i32
  }
  func.func @transform_1(%arg0: i32) -> (i32, i32) {
    %c0_i32 = arith.constant 0 : i32
    %c0_i32_0 = arith.constant 0 : i32
    %c0_i32_1 = arith.constant 0 : i32
    return %c0_i32, %c0_i32_0 : i32, i32
  }
  func.func @transform_2(%arg0: i32) -> (i32, i32) {
    %c0_i32 = arith.constant 0 : i32
    %c0_i32_0 = arith.constant 0 : i32
    %c0_i32_1 = arith.constant 0 : i32
    return %c0_i32, %c0_i32_0 : i32, i32
  }
  func.func @transform_3(%arg0: i32) -> (i32, i32, i32) {
    %c0_i32 = arith.constant 0 : i32
    %c0_i32_0 = arith.constant 0 : i32
    %c0_i32_1 = arith.constant 0 : i32
    return %arg0, %c0_i32, %c0_i32_0 : i32, i32, i32
  }
}

module attributes {stable_mosaic.version = 11 : i64} {
  func.func @_stage2_kernel(%arg0: i32, %arg1: memref<1x18x128xf32, #tpu.memory_space<vmem>>, %arg2: memref<1x1x128xf32, #tpu.memory_space<vmem>>, %arg3: memref<1x128xf32, #tpu.memory_space<vmem>>, %arg4: memref<1x128xf32, #tpu.memory_space<vmem>>, %arg5: memref<3x128xf32, #tpu.memory_space<vmem>>, %arg6: memref<128x128xf32, #tpu.memory_space<vmem>>, %arg7: memref<3x128xf32, #tpu.memory_space<vmem>>, %arg8: memref<128x256xf32, #tpu.memory_space<vmem>>, %arg9: memref<1x16x256xf32, #tpu.memory_space<vmem>>, %arg10: memref<1x2x256xf32, #tpu.memory_space<vmem>>) attributes {dimension_semantics = [#tpu.dimension_semantics<parallel>], iteration_bounds = array<i64: 1>, scalar_prefetch = 0 : i64, scratch_operands = 0 : i64, tpu.core_type = #tpu.core_type<tc>, window_params = [{transform_indices = @transform_0, window_bounds = array<i64: 1, 18, 128>}, {transform_indices = @transform_1, window_bounds = array<i64: 1, 1, 128>}, {pipeline_mode = #tpu.pipeline_mode<synchronous>, transform_indices = @transform_2, window_bounds = array<i64: 1, 128>}, {pipeline_mode = #tpu.pipeline_mode<synchronous>, transform_indices = @transform_3, window_bounds = array<i64: 1, 128>}, {pipeline_mode = #tpu.pipeline_mode<synchronous>, transform_indices = @transform_4, window_bounds = array<i64: 3, 128>}, {pipeline_mode = #tpu.pipeline_mode<synchronous>, transform_indices = @transform_5, window_bounds = array<i64: 128, 128>}, {pipeline_mode = #tpu.pipeline_mode<synchronous>, transform_indices = @transform_6, window_bounds = array<i64: 3, 128>}, {pipeline_mode = #tpu.pipeline_mode<synchronous>, transform_indices = @transform_7, window_bounds = array<i64: 128, 256>}, {transform_indices = @transform_8, window_bounds = array<i64: 1, 16, 256>}, {transform_indices = @transform_9, window_bounds = array<i64: 1, 2, 256>}]} {
    %cst = arith.constant 0.000000e+00 : f32
    %0 = vector.broadcast %cst : f32 to vector<1x16x128xf32>
    %c0 = arith.constant 0 : index
    %c0_0 = arith.constant 0 : index
    %c0_1 = arith.constant 0 : index
    %1 = vector.load %arg1[%c0, %c0_0, %c0_1] : memref<1x18x128xf32, #tpu.memory_space<vmem>>, vector<1x18x128xf32>
    %cst_2 = arith.constant 0.000000e+00 : f32
    %2 = vector.broadcast %cst_2 : f32 to vector<1x18x128xf32>
    %3 = arith.maximumf %1, %2 : vector<1x18x128xf32>
    %4 = vector.extract_strided_slice %3 {offsets = [0, 0, 0], sizes = [1, 16, 128], strides = [1, 1, 1]} : vector<1x18x128xf32> to vector<1x16x128xf32>
    %c0_3 = arith.constant 0 : index
    %c0_4 = arith.constant 0 : index
    %5 = vector.load %arg5[%c0_3, %c0_4] : memref<3x128xf32, #tpu.memory_space<vmem>>, vector<1x128xf32>
    %6 = vector.shape_cast %5 : vector<1x128xf32> to vector<1x1x128xf32>
    %7 = vector.broadcast %6 : vector<1x1x128xf32> to vector<1x16x128xf32>
    %8 = arith.mulf %4, %7 : vector<1x16x128xf32>
    %9 = arith.addf %0, %8 : vector<1x16x128xf32>
    %10 = vector.extract_strided_slice %3 {offsets = [0, 1, 0], sizes = [1, 16, 128], strides = [1, 1, 1]} : vector<1x18x128xf32> to vector<1x16x128xf32>
    %c1 = arith.constant 1 : index
    %c0_5 = arith.constant 0 : index
    %11 = vector.load %arg5[%c1, %c0_5] : memref<3x128xf32, #tpu.memory_space<vmem>>, vector<1x128xf32>
    %12 = vector.shape_cast %11 : vector<1x128xf32> to vector<1x1x128xf32>
    %13 = vector.broadcast %12 : vector<1x1x128xf32> to vector<1x16x128xf32>
    %14 = arith.mulf %10, %13 : vector<1x16x128xf32>
    %15 = arith.addf %9, %14 : vector<1x16x128xf32>
    %16 = vector.extract_strided_slice %3 {offsets = [0, 2, 0], sizes = [1, 16, 128], strides = [1, 1, 1]} : vector<1x18x128xf32> to vector<1x16x128xf32>
    %c2 = arith.constant 2 : index
    %c0_6 = arith.constant 0 : index
    %17 = vector.load %arg5[%c2, %c0_6] : memref<3x128xf32, #tpu.memory_space<vmem>>, vector<1x128xf32>
    %18 = vector.shape_cast %17 : vector<1x128xf32> to vector<1x1x128xf32>
    %19 = vector.broadcast %18 : vector<1x1x128xf32> to vector<1x16x128xf32>
    %20 = arith.mulf %16, %19 : vector<1x16x128xf32>
    %21 = arith.addf %15, %20 : vector<1x16x128xf32>
    %22 = vector.shape_cast %21 : vector<1x16x128xf32> to vector<16x128xf32>
    %c0_7 = arith.constant 0 : index
    %c0_8 = arith.constant 0 : index
    %23 = vector.load %arg6[%c0_7, %c0_8] : memref<128x128xf32, #tpu.memory_space<vmem>>, vector<128x128xf32>
    %cst_9 = arith.constant dense<0.000000e+00> : vector<16x128xf32>
    %24 = tpu.matmul %22, %23, %cst_9 {dimension_numbers = #tpu.dot_dimension_numbers<[1], [0], [0], [1], [0, 0, 1, 1], [], []>} : vector<16x128xf32>, vector<128x128xf32>, vector<16x128xf32> -> vector<16x128xf32>
    %25 = vector.shape_cast %24 : vector<16x128xf32> to vector<1x16x128xf32>
    %c0_10 = arith.constant 0 : index
    %c0_11 = arith.constant 0 : index
    %26 = vector.load %arg3[%c0_10, %c0_11] : memref<1x128xf32, #tpu.memory_space<vmem>>, vector<1x128xf32>
    %27 = vector.shape_cast %26 : vector<1x128xf32> to vector<1x1x128xf32>
    %28 = vector.broadcast %27 : vector<1x1x128xf32> to vector<1x16x128xf32>
    %29 = arith.mulf %25, %28 : vector<1x16x128xf32>
    %c0_12 = arith.constant 0 : index
    %c0_13 = arith.constant 0 : index
    %30 = vector.load %arg4[%c0_12, %c0_13] : memref<1x128xf32, #tpu.memory_space<vmem>>, vector<1x128xf32>
    %31 = vector.shape_cast %30 : vector<1x128xf32> to vector<1x1x128xf32>
    %32 = vector.broadcast %31 : vector<1x1x128xf32> to vector<1x16x128xf32>
    %33 = arith.addf %29, %32 : vector<1x16x128xf32>
    %cst_14 = arith.constant 0.000000e+00 : f32
    %34 = vector.broadcast %cst_14 : f32 to vector<1x16x128xf32>
    %35 = arith.maximumf %33, %34 : vector<1x16x128xf32>
    %c0_15 = arith.constant 0 : index
    %c0_16 = arith.constant 0 : index
    %c0_17 = arith.constant 0 : index
    %36 = vector.load %arg2[%c0_15, %c0_16, %c0_17] : memref<1x1x128xf32, #tpu.memory_space<vmem>>, vector<1x1x128xf32>
    %37 = vector.broadcast %36 : vector<1x1x128xf32> to vector<1x16x128xf32>
    %38 = arith.mulf %35, %37 : vector<1x16x128xf32>
    %cst_18 = arith.constant 0.000000e+00 : f32
    %39 = vector.broadcast %cst_18 : f32 to vector<1x1x128xf32>
    %cst_19 = arith.constant 0.000000e+00 : f32
    %40 = vector.broadcast %cst_19 : f32 to vector<1x1x128xf32>
    %41 = tpu.concatenate %39, %38, %40 in 1 : vector<1x1x128xf32>, vector<1x16x128xf32>, vector<1x1x128xf32> -> vector<1x18x128xf32>
    %cst_20 = arith.constant 0.000000e+00 : f32
    %42 = vector.broadcast %cst_20 : f32 to vector<1x16x128xf32>
    %43 = vector.extract_strided_slice %41 {offsets = [0, 0, 0], sizes = [1, 16, 128], strides = [1, 1, 1]} : vector<1x18x128xf32> to vector<1x16x128xf32>
    %c0_21 = arith.constant 0 : index
    %c0_22 = arith.constant 0 : index
    %44 = vector.load %arg7[%c0_21, %c0_22] : memref<3x128xf32, #tpu.memory_space<vmem>>, vector<1x128xf32>
    %45 = vector.shape_cast %44 : vector<1x128xf32> to vector<1x1x128xf32>
    %46 = vector.broadcast %45 : vector<1x1x128xf32> to vector<1x16x128xf32>
    %47 = arith.mulf %43, %46 : vector<1x16x128xf32>
    %48 = arith.addf %42, %47 : vector<1x16x128xf32>
    %49 = vector.extract_strided_slice %41 {offsets = [0, 1, 0], sizes = [1, 16, 128], strides = [1, 1, 1]} : vector<1x18x128xf32> to vector<1x16x128xf32>
    %c1_23 = arith.constant 1 : index
    %c0_24 = arith.constant 0 : index
    %50 = vector.load %arg7[%c1_23, %c0_24] : memref<3x128xf32, #tpu.memory_space<vmem>>, vector<1x128xf32>
    %51 = vector.shape_cast %50 : vector<1x128xf32> to vector<1x1x128xf32>
    %52 = vector.broadcast %51 : vector<1x1x128xf32> to vector<1x16x128xf32>
    %53 = arith.mulf %49, %52 : vector<1x16x128xf32>
    %54 = arith.addf %48, %53 : vector<1x16x128xf32>
    %55 = vector.extract_strided_slice %41 {offsets = [0, 2, 0], sizes = [1, 16, 128], strides = [1, 1, 1]} : vector<1x18x128xf32> to vector<1x16x128xf32>
    %c2_25 = arith.constant 2 : index
    %c0_26 = arith.constant 0 : index
    %56 = vector.load %arg7[%c2_25, %c0_26] : memref<3x128xf32, #tpu.memory_space<vmem>>, vector<1x128xf32>
    %57 = vector.shape_cast %56 : vector<1x128xf32> to vector<1x1x128xf32>
    %58 = vector.broadcast %57 : vector<1x1x128xf32> to vector<1x16x128xf32>
    %59 = arith.mulf %55, %58 : vector<1x16x128xf32>
    %60 = arith.addf %54, %59 : vector<1x16x128xf32>
    %61 = vector.shape_cast %60 : vector<1x16x128xf32> to vector<16x128xf32>
    %c0_27 = arith.constant 0 : index
    %c0_28 = arith.constant 0 : index
    %62 = vector.load %arg8[%c0_27, %c0_28] : memref<128x256xf32, #tpu.memory_space<vmem>>, vector<128x256xf32>
    %cst_29 = arith.constant dense<0.000000e+00> : vector<16x256xf32>
    %63 = tpu.matmul %61, %62, %cst_29 {dimension_numbers = #tpu.dot_dimension_numbers<[1], [0], [0], [1], [0, 0, 1, 1], [], []>} : vector<16x128xf32>, vector<128x256xf32>, vector<16x256xf32> -> vector<16x256xf32>
    %64 = vector.shape_cast %63 : vector<16x256xf32> to vector<1x16x256xf32>
    %65 = vector.shape_cast %64 : vector<1x16x256xf32> to vector<16x256xf32>
    %cst_30 = arith.constant dense<0.000000e+00> : vector<256xf32>
    %66 = vector.multi_reduction <add>, %65, %cst_30 [0] : vector<16x256xf32> to vector<256xf32>
    %67 = vector.shape_cast %66 : vector<256xf32> to vector<1x256xf32>
    %68 = arith.mulf %65, %65 : vector<16x256xf32>
    %cst_31 = arith.constant dense<0.000000e+00> : vector<256xf32>
    %69 = vector.multi_reduction <add>, %68, %cst_31 [0] : vector<16x256xf32> to vector<256xf32>
    %70 = vector.shape_cast %69 : vector<256xf32> to vector<1x256xf32>
    %71 = tpu.concatenate %67, %70 in 0 : vector<1x256xf32>, vector<1x256xf32> -> vector<2x256xf32>
    %72 = vector.shape_cast %71 : vector<2x256xf32> to vector<1x2x256xf32>
    %c0_32 = arith.constant 0 : index
    %c0_33 = arith.constant 0 : index
    %c0_34 = arith.constant 0 : index
    %73 = vector.load %arg10[%c0_32, %c0_33, %c0_34] : memref<1x2x256xf32, #tpu.memory_space<vmem>>, vector<1x2x256xf32>
    tpu.vector_store %arg10[%c0_32, %c0_33, %c0_34], %72 {strides = array<i32>} : memref<1x2x256xf32, #tpu.memory_space<vmem>>, vector<1x2x256xf32>,
    %c0_35 = arith.constant 0 : index
    %c0_36 = arith.constant 0 : index
    %c0_37 = arith.constant 0 : index
    %74 = vector.load %arg9[%c0_35, %c0_36, %c0_37] : memref<1x16x256xf32, #tpu.memory_space<vmem>>, vector<1x16x256xf32>
    tpu.vector_store %arg9[%c0_35, %c0_36, %c0_37], %64 {strides = array<i32>} : memref<1x16x256xf32, #tpu.memory_space<vmem>>, vector<1x16x256xf32>,
    return
  }
  func.func @transform_0(%arg0: i32) -> (i32, i32, i32) {
    %c0_i32 = arith.constant 0 : i32
    %c0_i32_0 = arith.constant 0 : i32
    %c0_i32_1 = arith.constant 0 : i32
    return %arg0, %c0_i32, %c0_i32_0 : i32, i32, i32
  }
  func.func @transform_1(%arg0: i32) -> (i32, i32, i32) {
    %c0_i32 = arith.constant 0 : i32
    %c0_i32_0 = arith.constant 0 : i32
    %c0_i32_1 = arith.constant 0 : i32
    return %arg0, %c0_i32, %c0_i32_0 : i32, i32, i32
  }
  func.func @transform_2(%arg0: i32) -> (i32, i32) {
    %c0_i32 = arith.constant 0 : i32
    %c0_i32_0 = arith.constant 0 : i32
    %c0_i32_1 = arith.constant 0 : i32
    return %c0_i32, %c0_i32_0 : i32, i32
  }
  func.func @transform_3(%arg0: i32) -> (i32, i32) {
    %c0_i32 = arith.constant 0 : i32
    %c0_i32_0 = arith.constant 0 : i32
    %c0_i32_1 = arith.constant 0 : i32
    return %c0_i32, %c0_i32_0 : i32, i32
  }
  func.func @transform_4(%arg0: i32) -> (i32, i32) {
    %c0_i32 = arith.constant 0 : i32
    %c0_i32_0 = arith.constant 0 : i32
    %c0_i32_1 = arith.constant 0 : i32
    return %c0_i32, %c0_i32_0 : i32, i32
  }
  func.func @transform_5(%arg0: i32) -> (i32, i32) {
    %c0_i32 = arith.constant 0 : i32
    %c0_i32_0 = arith.constant 0 : i32
    %c0_i32_1 = arith.constant 0 : i32
    return %c0_i32, %c0_i32_0 : i32, i32
  }
  func.func @transform_6(%arg0: i32) -> (i32, i32) {
    %c0_i32 = arith.constant 0 : i32
    %c0_i32_0 = arith.constant 0 : i32
    %c0_i32_1 = arith.constant 0 : i32
    return %c0_i32, %c0_i32_0 : i32, i32
  }
  func.func @transform_7(%arg0: i32) -> (i32, i32) {
    %c0_i32 = arith.constant 0 : i32
    %c0_i32_0 = arith.constant 0 : i32
    %c0_i32_1 = arith.constant 0 : i32
    return %c0_i32, %c0_i32_0 : i32, i32
  }
  func.func @transform_8(%arg0: i32) -> (i32, i32, i32) {
    %c0_i32 = arith.constant 0 : i32
    %c0_i32_0 = arith.constant 0 : i32
    %c0_i32_1 = arith.constant 0 : i32
    return %arg0, %c0_i32, %c0_i32_0 : i32, i32, i32
  }
  func.func @transform_9(%arg0: i32) -> (i32, i32, i32) {
    %c0_i32 = arith.constant 0 : i32
    %c0_i32_0 = arith.constant 0 : i32
    %c0_i32_1 = arith.constant 0 : i32
    return %arg0, %c0_i32, %c0_i32_0 : i32, i32, i32
  }
}

</mosaic_0001>

<bundles_post_ra>
// kernel: tile.24
= control target key start
LH: loop header
LB: loop body
LE: loop exit
PB: predicated region body
PF: predicated region fallthrough
CT: control target
= control target key end

     0   :  { %vm5_vm0 = vcmask 1041409   ;;  %vm9_vm1 = vcmask 1042434   ;;  %s579_s20 = smov 124   ;;  %s580_s2 = smov 116   ;;  %vm11_vm2 = vcmask 31744   ;;  %vm25_vm3 = vcmask 1048544   ;;  %s975_s0 = inlined_call_operand.vmem [shape: f32[3,32,4], index: 0, kind: input, shape index: {}]   ;;  %s976_s1 = inlined_call_operand.vmem [shape: f32[3,128], index: 1, kind: output, shape index: {}]  }
   0x1   :  { %v455_v0 = vld [vmem:[%s975_s0 + $0x1f] sm:$0x1]   ;;  %v461_v4 = vld [vmem:[%s975_s0 + $0x1d] sm:$0x1]   ;;  %v458_v8 = vld [vmem:[%s975_s0 + $0x1e] sm:$0x1]  }
   0x2   :  { %v456_v1 = vld [vmem:[%s975_s0 + $0x3e] sm:$0x2]   ;;  %v462_v6 = vld [vmem:[%s975_s0 + $0x3c] sm:$0x2]   ;;  %v459_v10 = vld [vmem:[%s975_s0 + $0x3d] sm:$0x2]  }
   0x3   :  { %v18_v2 = vsel %vm5_vm0, %v456_v1, %v455_v0  ;;  %v457_v3 = vld [vmem:[%s975_s0 + $0x5d] sm:$0x4]   ;;  %v463_v7 = vld [vmem:[%s975_s0 + $0x5b] sm:$0x4]   ;;  %v46_v9 = vsel %vm5_vm0, %v462_v6, %v461_v4  ;;  %v460_v11 = vld [vmem:[%s975_s0 + $0x5c] sm:$0x4]   ;;  %v32_v13 = vsel %vm5_vm0, %v459_v10, %v458_v8 }
   0x4   :  { %v22_v5 = vsel %vm9_vm1, %v457_v3, %v18_v2  ;;  %v50_v12 = vsel %vm9_vm1, %v463_v7, %v46_v9  ;;  %v464_v14 = vld [vmem:[%s975_s0 + $0x1c] sm:$0x1]   ;;  %v36_v17 = vsel %vm9_vm1, %v460_v11, %v32_v13  ;;  %v467_v19 = vld [vmem:[%s975_s0 + $0x1b] sm:$0x1]   ;;  %v470_v24 = vld [vmem:[%s975_s0 + $0x1a] sm:$0x1]  }
   0x5   :  { %23 = vrot.lane.b32.xlu0 %v22_v5, %s579_s20  ;;  %v465_v15 = vld [vmem:[%s975_s0 + $0x3b] sm:$0x2]   ;;  %51 = vrot.lane.b32.xlu1 %v50_v12, %s580_s2  ;;  %v468_v20 = vld [vmem:[%s975_s0 + $0x3a] sm:$0x2]   ;;  %s581_s13 = smov 120   ;;  %s582_s22 = smov 112  }
   0x6   :  { %v466_v16 = vld [vmem:[%s975_s0 + $0x5a] sm:$0x4]   ;;  %v60_v18 = vsel %vm5_vm0, %v465_v15, %v464_v14  ;;  %v469_v21 = vld [vmem:[%s975_s0 + $0x59] sm:$0x4]   ;;  %v74_v23 = vsel %vm5_vm0, %v468_v20, %v467_v19  ;;  %v471_v25 = vld [vmem:[%s975_s0 + $0x39] sm:$0x2]  }
   0x7   :  { %v64_v22 = vsel %vm9_vm1, %v466_v16, %v60_v18  ;;  %v88_v26 = vsel %vm5_vm0, %v471_v25, %v470_v24  ;;  %v472_v27 = vld [vmem:[%s975_s0 + $0x58] sm:$0x4]   ;;  %v473_v28 = vld [vmem:[%s975_s0 + $0x19] sm:$0x1]   ;;  %v78_v30 = vsel %vm9_vm1, %v469_v21, %v74_v23  ;;  %v476_v31 = vld [vmem:[%s975_s0 + $0x18] sm:$0x1]  }
   0x8   :  { %v474_v29 = vld [vmem:[%s975_s0 + $0x38] sm:$0x2]   ;;  %v477_v34 = vld [vmem:[%s975_s0 + $0x37] sm:$0x2]   ;;  %v92_v35 = vsel %vm9_vm1, %v472_v27, %v88_v26  ;;  %v479_v36 = vld [vmem:[%s975_s0 + $0x17] sm:$0x1]  }
   0x9   :  { %37 = vrot.lane.b32.xlu0 %v36_v17, %s581_s13  ;;  %65 = vrot.lane.b32.xlu1 %v64_v22, %s582_s22  ;;  %v102_v32 = vsel %vm5_vm0, %v474_v29, %v473_v28  ;;  %v475_v33 = vld [vmem:[%s975_s0 + $0x57] sm:$0x4]   ;;  %v480_v37 = vld [vmem:[%s975_s0 + $0x36] sm:$0x2]   ;;  %s583_s2 = smov 108   ;;  %v116_v38 = vsel %vm5_vm0, %v477_v34, %v476_v31  ;;  %s584_s9 = smov 104  }
   0xa   :  { %v478_v39 = vld [vmem:[%s975_s0 + $0x56] sm:$0x4]   ;;  %v106_v40 = vsel %vm9_vm1, %v475_v33, %v102_v32  ;;  %v482_v41 = vld [vmem:[%s975_s0 + $0x16] sm:$0x1]   ;;  %v130_v43 = vsel %vm5_vm0, %v480_v37, %v479_v36  ;;  %v481_v44 = vld [vmem:[%s975_s0 + $0x55] sm:$0x4]  }
   0xb   :  { %v483_v42 = vld [vmem:[%s975_s0 + $0x35] sm:$0x2]   ;;  %v120_v45 = vsel %vm9_vm1, %v478_v39, %v116_v38  ;;  %v485_v46 = vld [vmem:[%s975_s0 + $0x15] sm:$0x1]   ;;  %s585_s16 = smov 100   ;;  %v134_v50 = vsel %vm9_vm1, %v481_v44, %v130_v43  ;;  %s586_s23 = smov 96  }
   0xc   :  { %v486_v47 = vld [vmem:[%s975_s0 + $0x34] sm:$0x2]   ;;  %v144_v48 = vsel %vm5_vm0, %v483_v42, %v482_v41  ;;  %v484_v49 = vld [vmem:[%s975_s0 + $0x54] sm:$0x4]   ;;  %v488_v51 = vld [vmem:[%s975_s0 + $0x14] sm:$0x1]  }
   0xd   :  { %79 = vrot.lane.b32.xlu0 %v78_v30, %s583_s2  ;;  %93 = vrot.lane.b32.xlu1 %v92_v35, %s584_s9  ;;  %v489_v52 = vld [vmem:[%s975_s0 + $0x33] sm:$0x2]   ;;  %v158_v53 = vsel %vm5_vm0, %v486_v47, %v485_v46  ;;  %v487_v54 = vld [vmem:[%s975_s0 + $0x53] sm:$0x4]   ;;  %v148_v55 = vsel %vm9_vm1, %v484_v49, %v144_v48  ;;  %s587_s30 = smov 92   ;;  %s588_s8 = smov 88  }
   0xe   :  { %v491_v56 = vld [vmem:[%s975_s0 + $0x13] sm:$0x1]   ;;  %v172_v58 = vsel %vm5_vm0, %v489_v52, %v488_v51  ;;  %v490_v59 = vld [vmem:[%s975_s0 + $0x52] sm:$0x4]   ;;  %v162_v60 = vsel %vm9_vm1, %v487_v54, %v158_v53  ;;  %v494_v61 = vld [vmem:[%s975_s0 + $0x12] sm:$0x1]  }
   0xf   :  { %v492_v57 = vld [vmem:[%s975_s0 + $0x32] sm:$0x2]   ;;  %v495_v62 = vld [vmem:[%s975_s0 + $0x31] sm:$0x2]   ;;  %v176_v1 = vsel %vm9_vm1, %v490_v59, %v172_v58  ;;  %v497_v2 = vld [vmem:[%s975_s0 + $0x11] sm:$0x1]  }
  0x10   :  { %v186_v63 = vsel %vm5_vm0, %v492_v57, %v491_v56  ;;  %v493_v0 = vld [vmem:[%s975_s0 + $0x51] sm:$0x4]   ;;  %v498_v3 = vld [vmem:[%s975_s0 + $0x30] sm:$0x2]   ;;  %s589_s15 = smov 84   ;;  %v200_v4 = vsel %vm5_vm0, %v495_v62, %v494_v61  ;;  %s590_s22 = smov 80  }
  0x11   :  { %107 = vrot.lane.b32.xlu0 %v106_v40, %s585_s16  ;;  %121 = vrot.lane.b32.xlu1 %v120_v45, %s586_s23  ;;  %v496_v5 = vld [vmem:[%s975_s0 + $0x50] sm:$0x4]   ;;  %v190_v6 = vsel %vm9_vm1, %v493_v0, %v186_v63  ;;  %v500_v7 = vld [vmem:[%s975_s0 + $0x10] sm:$0x1]   ;;  %v214_v9 = vsel %vm5_vm0, %v498_v3, %v497_v2  ;;  %s591_s29 = smov 76   ;;  %s592_s7 = smov 72  }
  0x12   :  { %v501_v8 = vld [vmem:[%s975_s0 + $0x2f] sm:$0x2]   ;;  %v499_v10 = vld [vmem:[%s975_s0 + $0x4f] sm:$0x4]   ;;  %v204_v11 = vsel %vm9_vm1, %v496_v5, %v200_v4  ;;  %v503_v12 = vld [vmem:[%s975_s0 + $0xf] sm:$0x1]  }
  0x13   :  { %v504_v13 = vld [vmem:[%s975_s0 + $0x2e] sm:$0x2]   ;;  %v228_v14 = vsel %vm5_vm0, %v501_v8, %v500_v7  ;;  %v502_v15 = vld [vmem:[%s975_s0 + $0x4e] sm:$0x4]   ;;  %v218_v16 = vsel %vm9_vm1, %v499_v10, %v214_v9  ;;  %v506_v17 = vld [vmem:[%s975_s0 + $0xe] sm:$0x1]  }
  0x14   :  { %v507_v18 = vld [vmem:[%s975_s0 + $0x2d] sm:$0x2]   ;;  %v242_v19 = vsel %vm5_vm0, %v504_v13, %v503_v12  ;;  %v505_v20 = vld [vmem:[%s975_s0 + $0x4d] sm:$0x4]   ;;  %v232_v21 = vsel %vm9_vm1, %v502_v15, %v228_v14  ;;  %v509_v22 = vld [vmem:[%s975_s0 + $0xd] sm:$0x1]  }
  0x15   :  { %135 = vrot.lane.b32.xlu0 %v134_v50, %s587_s30  ;;  %149 = vrot.lane.b32.xlu1 %v148_v55, %s588_s8  ;;  %v510_v23 = vld [vmem:[%s975_s0 + $0x2c] sm:$0x2]   ;;  %s593_s14 = smov 68   ;;  %v256_v24 = vsel %vm5_vm0, %v507_v18, %v506_v17  ;;  %v508_v25 = vld [vmem:[%s975_s0 + $0x4c] sm:$0x4]   ;;  %v246_v26 = vsel %vm9_vm1, %v505_v20, %v242_v19  ;;  %s594_s21 = smov 64  }
  0x16   :  { %v512_v27 = vld [vmem:[%s975_s0 + $0xc] sm:$0x1]   ;;  %v270_v29 = vsel %vm5_vm0, %v510_v23, %v509_v22  ;;  %v511_v30 = vld [vmem:[%s975_s0 + $0x4b] sm:$0x4]   ;;  %v260_v31 = vsel %vm9_vm1, %v508_v25, %v256_v24  ;;  %v515_v32 = vld [vmem:[%s975_s0 + $0xb] sm:$0x1]  }
  0x17   :  { %v513_v28 = vld [vmem:[%s975_s0 + $0x2b] sm:$0x2]   ;;  %v516_v33 = vld [vmem:[%s975_s0 + $0x2a] sm:$0x2]   ;;  %s595_s28 = smov 60   ;;  %v274_v37 = vsel %vm9_vm1, %v511_v30, %v270_v29  ;;  %s596_s10 = smov 56  }
  0x18   :  { %v284_v34 = vsel %vm5_vm0, %v513_v28, %v512_v27  ;;  %v514_v35 = vld [vmem:[%s975_s0 + $0x4a] sm:$0x4]   ;;  %v517_v36 = vld [vmem:[%s975_s0 + $0x49] sm:$0x4]   ;;  %v518_v38 = vld [vmem:[%s975_s0 + $0xa] sm:$0x1]   ;;  %v298_v41 = vsel %vm5_vm0, %v516_v33, %v515_v32 }
  0x19   :  { %163 = vrot.lane.b32.xlu0 %v162_v60, %s589_s15  ;;  %177 = vrot.lane.b32.xlu1 %v176_v1, %s590_s22  ;;  %v519_v39 = vld [vmem:[%s975_s0 + $0x29] sm:$0x2]   ;;  %v454_v40 = vld [vmem:[%s975_s0 + $0x3e] sm:$0x4]   ;;  %v288_v44 = vsel %vm9_vm1, %v514_v35, %v284_v34  ;;  %s597_s19 = smov 52   ;;  %v302_v51 = vsel %vm9_vm1, %v517_v36, %v298_v41  ;;  %s598_s26 = smov 48  }
  0x1a   :  { %v2_v42 = vld [vmem:[%s975_s0] sm:$0x1]   ;;  %v521_v45 = vld [vmem:[%s975_s0 + $0x9] sm:$0x1]   ;;  %v312_v48 = vsel %vm5_vm0, %v519_v39, %v518_v38  ;;  %v520_v49 = vld [vmem:[%s975_s0 + $0x48] sm:$0x4]  }
  0x1b   :  { %v453_v43 = vld [vmem:[%s975_s0 + $0x1f] sm:$0x2]   ;;  %v522_v46 = vld [vmem:[%s975_s0 + $0x28] sm:$0x2]   ;;  %v524_v52 = vld [vmem:[%s975_s0 + $0x8] sm:$0x1]   ;;  %v316_v56 = vsel %vm9_vm1, %v520_v49, %v312_v48 }
  0x1c   :  { %v6_v47 = vsel %vm5_vm0, %v453_v43, %v2_v42  ;;  %v525_v53 = vld [vmem:[%s975_s0 + $0x27] sm:$0x2]   ;;  %v326_v54 = vsel %vm5_vm0, %v522_v46, %v521_v45  ;;  %v523_v55 = vld [vmem:[%s975_s0 + $0x47] sm:$0x4]   ;;  %v527_v57 = vld [vmem:[%s975_s0 + $0x7] sm:$0x1]  }
  0x1d   :  { %191 = vrot.lane.b32.xlu0 %v190_v6, %s591_s29  ;;  %205 = vrot.lane.b32.xlu1 %v204_v11, %s592_s7  ;;  %v10_v50 = vsel %vm9_vm1, %v454_v40, %v6_v47  ;;  %v528_v58 = vld [vmem:[%s975_s0 + $0x26] sm:$0x2]   ;;  %s599_s4 = smov 44   ;;  %v340_v59 = vsel %vm5_vm0, %v525_v53, %v524_v52  ;;  %v526_v60 = vld [vmem:[%s975_s0 + $0x46] sm:$0x4]   ;;  %v330_v61 = vsel %vm9_vm1, %v523_v55, %v326_v54  ;;  %s600_s11 = smov 40  }
  0x1e   :  { %12 = vst.msk [vmem:[#allocation0] sm:$0x7] %vm11_vm2, %v10_v50   ;;  %v530_v62 = vld [vmem:[%s975_s0 + $0x6] sm:$0x1]   ;;  %v354_v0 = vsel %vm5_vm0, %v528_v58, %v527_v57  ;;  %v529_v1 = vld [vmem:[%s975_s0 + $0x45] sm:$0x4]   ;;  %v344_v2 = vsel %vm9_vm1, %v526_v60, %v340_v59 }
  0x1f   :  { %v531_v63 = vld [vmem:[%s975_s0 + $0x25] sm:$0x2]   ;;  %v533_v3 = vld [vmem:[%s975_s0 + $0x5] sm:$0x1]   ;;  %s601_s18 = smov 36   ;;  %v358_v7 = vsel %vm9_vm1, %v529_v1, %v354_v0  ;;  %s602_s25 = smov 32  }
  0x20   :  { %v534_v4 = vld [vmem:[%s975_s0 + $0x24] sm:$0x2]   ;;  %v368_v5 = vsel %vm5_vm0, %v531_v63, %v530_v62  ;;  %v532_v6 = vld [vmem:[%s975_s0 + $0x44] sm:$0x4]   ;;  %v536_v8 = vld [vmem:[%s975_s0 + $0x4] sm:$0x1]  }
  0x21   :  { %219 = vrot.lane.b32.xlu0 %v218_v16, %s593_s14  ;;  %233 = vrot.lane.b32.xlu1 %v232_v21, %s594_s21  ;;  %v537_v9 = vld [vmem:[%s975_s0 + $0x23] sm:$0x2]   ;;  %v382_v10 = vsel %vm5_vm0, %v534_v4, %v533_v3  ;;  %v535_v11 = vld [vmem:[%s975_s0 + $0x43] sm:$0x4]   ;;  %v372_v12 = vsel %vm9_vm1, %v532_v6, %v368_v5  ;;  %s603_s3 = smov 28   ;;  %s605_s17 = smov 20  }
  0x22   :  { %v539_v13 = vld [vmem:[%s975_s0 + $0x3] sm:$0x1]   ;;  %v396_v15 = vsel %vm5_vm0, %v537_v9, %v536_v8  ;;  %v538_v16 = vld [vmem:[%s975_s0 + $0x42] sm:$0x4]   ;;  %v386_v17 = vsel %vm9_vm1, %v535_v11, %v382_v10  ;;  %v542_v18 = vld [vmem:[%s975_s0 + $0x2] sm:$0x1]  }
  0x23   :  { %v540_v14 = vld [vmem:[%s975_s0 + $0x22] sm:$0x2]   ;;  %v543_v19 = vld [vmem:[%s975_s0 + $0x21] sm:$0x2]   ;;  %v400_v22 = vsel %vm9_vm1, %v538_v16, %v396_v15  ;;  %v545_v23 = vld [vmem:[%s975_s0 + $0x1] sm:$0x1]  }
  0x24   :  { %v410_v20 = vsel %vm5_vm0, %v540_v14, %v539_v13  ;;  %v541_v21 = vld [vmem:[%s975_s0 + $0x41] sm:$0x4]   ;;  %v546_v24 = vld [vmem:[%s975_s0 + $0x20] sm:$0x2]   ;;  %v424_v25 = vsel %vm5_vm0, %v543_v19, %v542_v18  ;;  %s606_s20 = smov 16   ;;  %s608_s23 = smov 8  }
  0x25   :  { %247 = vrot.lane.b32.xlu0 %v246_v26, %s595_s28  ;;  %261 = vrot.lane.b32.xlu1 %v260_v31, %s596_s10  ;;  %s604_s10 = smov 24   ;;  %v544_v26 = vld [vmem:[%s975_s0 + $0x40] sm:$0x4]   ;;  %v414_v27 = vsel %vm9_vm1, %v541_v21, %v410_v20  ;;  %v438_v28 = vsel %vm5_vm0, %v546_v24, %v545_v23  ;;  %v547_v29 = vld [vmem:[%s975_s0 + $0x3f] sm:$0x4]   ;;  %s607_s0 = smov 12  }
  0x26   :  { %v428_v30 = vsel %vm9_vm1, %v544_v26, %v424_v25  ;;  %v442_v31 = vsel %vm9_vm1, %v547_v29, %v438_v28  ;;  %s609_s24 = smov 4   ;;  %vm39_vm4 = vcmask 1015744   ;;  %vm53_vm5 = vcmask 982944  }
  0x27   :  { %vm67_vm6 = vcmask 950144   ;;  %vm81_vm7 = vcmask 917344   ;;  %vm95_vm8 = vcmask 884544   ;;  %vm109_vm9 = vcmask 851744  }
  0x28   :  { %vm123_vm10 = vcmask 818944   ;;  %vm137_vm11 = vcmask 786144   ;;  %vm151_vm12 = vcmask 753344   ;;  %vm165_vm13 = vcmask 720544  }
  0x29   :  { %275 = vrot.lane.b32.xlu0 %v274_v37, %s597_s19  ;;  %289 = vrot.lane.b32.xlu1 %v288_v44, %s598_s26  ;;  %vm179_vm14 = vcmask 687744   ;;  %vm193_vm15 = vcmask 654944   ;;  %vm207_vm0 = vcmask 622144   ;;  %vm221_vm1 = vcmask 589344  }
  0x2a   :  { %vm235_vm2 = vcmask 556544  }
  0x2d   :  { %303 = vrot.lane.b32.xlu0 %v302_v51, %s599_s4  ;;  %317 = vrot.lane.b32.xlu1 %v316_v56, %s600_s11 }
  0x31   :  { %331 = vrot.lane.b32.xlu0 %v330_v61, %s601_s18  ;;  %345 = vrot.lane.b32.xlu1 %v344_v2, %s602_s25 }
  0x35   :  { %359 = vrot.lane.b32.xlu0 %v358_v7, %s603_s3  ;;  %373 = vrot.lane.b32.xlu1 %v372_v12, %s604_s10 }
  0x39   :  { %387 = vrot.lane.b32.xlu0 %v386_v17, %s605_s17  ;;  %401 = vrot.lane.b32.xlu1 %v400_v22, %s606_s20 }
  0x3d   :  { %415 = vrot.lane.b32.xlu0 %v414_v27, %s607_s0  ;;  %429 = vrot.lane.b32.xlu1 %v428_v30, %s608_s23 }
  0x41   :  { %443 = vrot.lane.b32.xlu0 %v442_v31, %s609_s24 }
  0x77   :  { %v24_v32 = vpop.permute.xlu0 %23   ;;  %v52_v33 = vpop.permute.xlu1 %51  }
  0x78   :  { %26 = vst.msk [vmem:[#allocation0] sm:$0x7] %vm25_vm3, %v24_v32   ;;  %vm249_vm3 = vcmask 523744  }
  0x7b   :  { %v38_v34 = vpop.permute.xlu0 %37   ;;  %v66_v35 = vpop.permute.xlu1 %65  }
  0x7c   :  { %40 = vst.msk [vmem:[#allocation0] sm:$0x7] %vm39_vm4, %v38_v34   ;;  %vm263_vm4 = vcmask 490944  }
  0x7d   :  { %54 = vst.msk [vmem:[#allocation0] sm:$0x7] %vm53_vm5, %v52_v33   ;;  %vm277_vm5 = vcmask 458144  }
  0x7e   :  { %68 = vst.msk [vmem:[#allocation0] sm:$0x7] %vm67_vm6, %v66_v35   ;;  %vm291_vm6 = vcmask 425344  }
  0x7f   :  { %v80_v36 = vpop.permute.xlu0 %79   ;;  %v94_v37 = vpop.permute.xlu1 %93  }
  0x80   :  { %82 = vst.msk [vmem:[#allocation0] sm:$0x7] %vm81_vm7, %v80_v36   ;;  %vm305_vm7 = vcmask 392544  }
  0x81   :  { %96 = vst.msk [vmem:[#allocation0] sm:$0x7] %vm95_vm8, %v94_v37   ;;  %vm319_vm8 = vcmask 359744  }
  0x83   :  { %v108_v38 = vpop.permute.xlu0 %107   ;;  %v122_v39 = vpop.permute.xlu1 %121  }
  0x84   :  { %110 = vst.msk [vmem:[#allocation0] sm:$0x7] %vm109_vm9, %v108_v38   ;;  %vm333_vm9 = vcmask 326944  }
  0x85   :  { %124 = vst.msk [vmem:[#allocation0] sm:$0x7] %vm123_vm10, %v122_v39   ;;  %vm347_vm10 = vcmask 294144  }
  0x87   :  { %v136_v40 = vpop.permute.xlu0 %135   ;;  %v150_v41 = vpop.permute.xlu1 %149  }
  0x88   :  { %138 = vst.msk [vmem:[#allocation0] sm:$0x7] %vm137_vm11, %v136_v40   ;;  %vm361_vm11 = vcmask 261344  }
  0x89   :  { %152 = vst.msk [vmem:[#allocation0] sm:$0x7] %vm151_vm12, %v150_v41   ;;  %vm375_vm12 = vcmask 228544  }
  0x8b   :  { %v164_v42 = vpop.permute.xlu0 %163   ;;  %v178_v43 = vpop.permute.xlu1 %177  }
  0x8c   :  { %166 = vst.msk [vmem:[#allocation0] sm:$0x7] %vm165_vm13, %v164_v42   ;;  %vm389_vm13 = vcmask 195744  }
  0x8d   :  { %180 = vst.msk [vmem:[#allocation0] sm:$0x7] %vm179_vm14, %v178_v43   ;;  %vm403_vm14 = vcmask 162944  }
  0x8f   :  { %v192_v44 = vpop.permute.xlu0 %191   ;;  %v206_v45 = vpop.permute.xlu1 %205  }
  0x90   :  { %194 = vst.msk [vmem:[#allocation0] sm:$0x7] %vm193_vm15, %v192_v44   ;;  %vm417_vm15 = vcmask 130144  }
  0x91   :  { %208 = vst.msk [vmem:[#allocation0] sm:$0x7] %vm207_vm0, %v206_v45   ;;  %vm431_vm0 = vcmask 97344  }
  0x93   :  { %v220_v46 = vpop.permute.xlu0 %219   ;;  %v234_v47 = vpop.permute.xlu1 %233  }
  0x94   :  { %222 = vst.msk [vmem:[#allocation0] sm:$0x7] %vm221_vm1, %v220_v46   ;;  %vm445_vm1 = vcmask 64544  }
  0x95   :  { %236 = vst.msk [vmem:[#allocation0] sm:$0x7] %vm235_vm2, %v234_v47  }
  0x97   :  { %v248_v48 = vpop.permute.xlu0 %247   ;;  %v262_v49 = vpop.permute.xlu1 %261  }
  0x98   :  { %250 = vst.msk [vmem:[#allocation0] sm:$0x7] %vm249_vm3, %v248_v48  }
  0x99   :  { %264 = vst.msk [vmem:[#allocation0] sm:$0x7] %vm263_vm4, %v262_v49  }
  0x9b   :  { %v276_v50 = vpop.permute.xlu0 %275   ;;  %v290_v51 = vpop.permute.xlu1 %289  }
  0x9c   :  { %278 = vst.msk [vmem:[#allocation0] sm:$0x7] %vm277_vm5, %v276_v50  }
  0x9d   :  { %292 = vst.msk [vmem:[#allocation0] sm:$0x7] %vm291_vm6, %v290_v51  }
  0x9f   :  { %v304_v52 = vpop.permute.xlu0 %303   ;;  %v318_v53 = vpop.permute.xlu1 %317  }
  0xa0   :  { %306 = vst.msk [vmem:[#allocation0] sm:$0x7] %vm305_vm7, %v304_v52  }
  0xa1   :  { %320 = vst.msk [vmem:[#allocation0] sm:$0x7] %vm319_vm8, %v318_v53  }
  0xa3   :  { %v332_v54 = vpop.permute.xlu0 %331   ;;  %v346_v55 = vpop.permute.xlu1 %345  }
  0xa4   :  { %334 = vst.msk [vmem:[#allocation0] sm:$0x7] %vm333_vm9, %v332_v54  }
  0xa5   :  { %348 = vst.msk [vmem:[#allocation0] sm:$0x7] %vm347_vm10, %v346_v55  }
  0xa7   :  { %v360_v56 = vpop.permute.xlu0 %359   ;;  %v374_v57 = vpop.permute.xlu1 %373  }
  0xa8   :  { %362 = vst.msk [vmem:[#allocation0] sm:$0x7] %vm361_vm11, %v360_v56  }
  0xa9   :  { %376 = vst.msk [vmem:[#allocation0] sm:$0x7] %vm375_vm12, %v374_v57  }
  0xab   :  { %v388_v58 = vpop.permute.xlu0 %387   ;;  %v402_v59 = vpop.permute.xlu1 %401  }
  0xac   :  { %390 = vst.msk [vmem:[#allocation0] sm:$0x7] %vm389_vm13, %v388_v58  }
  0xad   :  { %404 = vst.msk [vmem:[#allocation0] sm:$0x7] %vm403_vm14, %v402_v59  }
  0xaf   :  { %v416_v60 = vpop.permute.xlu0 %415   ;;  %v430_v61 = vpop.permute.xlu1 %429  }
  0xb0   :  { %418 = vst.msk [vmem:[#allocation0] sm:$0x7] %vm417_vm15, %v416_v60  }
  0xb1   :  { %432 = vst.msk [vmem:[#allocation0] sm:$0x7] %vm431_vm0, %v430_v61  }
  0xb3   :  { %v444_v62 = vpop.permute.xlu0 %443  }
  0xb4   :  { %446 = vst.msk [vmem:[#allocation0] sm:$0x7] %vm445_vm1, %v444_v62  }
  0xbb   :  { %v450_v63 = vld [vmem:[#allocation0] sm:$0xf] }
  0xbc   :  { %452 = vst [vmem:[%s976_s1] sm:$0xf] %v450_v63 }

// kernel: tile.33
= control target key start
LH: loop header
LB: loop body
LE: loop exit
PB: predicated region body
PF: predicated region fallthrough
CT: control target
= control target key end

     0   :  { %s40_s0 = inlined_call_operand.vmem [shape: f32[4], index: 0, kind: input, shape index: {}]   ;;  %s41_s1 = inlined_call_operand.vmem [shape: f32[32,4], index: 1, kind: output, shape index: {}]  }
   0x1   :  { %v4_v0 = vld [vmem:[%s40_s0] ss:$0 sm:$0xff] }
   0x2   :  { %5 = vst [vmem:[%s41_s1] sm:$0xff] %v4_v0  ;;  %12 = vst [vmem:[%s41_s1 + $0x8] sm:$0xff] %v4_v0 }
   0x3   :  { %13 = vst [vmem:[%s41_s1 + $0x10] sm:$0xff] %v4_v0  ;;  %14 = vst [vmem:[%s41_s1 + $0x18] sm:$0xff] %v4_v0 }

// kernel: tile.34
= control target key start
LH: loop header
LB: loop body
LE: loop exit
PB: predicated region body
PF: predicated region fallthrough
CT: control target
= control target key end

     0   :  { %s259_s10 = smov 124   ;;  %s260_s11 = smov 116   ;;  %vm3_vm0 = vcmask 31744   ;;  %vm9_vm1 = vcmask 1048544   ;;  %vm15_vm2 = vcmask 1015744   ;;  %vm21_vm3 = vcmask 982944   ;;  %s399_s0 = inlined_call_operand.vmem [shape: f32[32,4], index: 0, kind: input, shape index: {}]   ;;  %s400_s1 = inlined_call_operand.vmem [shape: f32[1,128], index: 1, kind: output, shape index: {}]  }
   0x1   :  { %v197_v0 = vld [vmem:[%s399_s0 + $0x1f] sm:$0x1]   ;;  %v199_v1 = vld [vmem:[%s399_s0 + $0x1d] sm:$0x1]   ;;  %v198_v2 = vld [vmem:[%s399_s0 + $0x1e] sm:$0x1]  }
   0x2   :  { %7 = vrot.lane.b32.xlu0 %v197_v0, %s259_s10  ;;  %19 = vrot.lane.b32.xlu1 %v199_v1, %s260_s11  ;;  %v200_v3 = vld [vmem:[%s399_s0 + $0x1c] sm:$0x1]   ;;  %s261_s16 = smov 120   ;;  %s262_s17 = smov 112   ;;  %v201_v4 = vld [vmem:[%s399_s0 + $0x1b] sm:$0x1]  }
   0x3   :  { %v202_v5 = vld [vmem:[%s399_s0 + $0x1a] sm:$0x1]   ;;  %s263_s22 = smov 108   ;;  %s264_s23 = smov 104   ;;  %v203_v6 = vld [vmem:[%s399_s0 + $0x19] sm:$0x1]  }
   0x4   :  { %v204_v7 = vld [vmem:[%s399_s0 + $0x18] sm:$0x1]   ;;  %s265_s28 = smov 100   ;;  %s266_s29 = smov 96   ;;  %v205_v8 = vld [vmem:[%s399_s0 + $0x17] sm:$0x1]  }
   0x5   :  { %v206_v9 = vld [vmem:[%s399_s0 + $0x16] sm:$0x1]   ;;  %v2_v10 = vld [vmem:[%s399_s0] sm:$0x1]   ;;  %s267_s7 = smov 92   ;;  %s268_s8 = smov 88  }
   0x6   :  { %13 = vrot.lane.b32.xlu0 %v198_v2, %s261_s16  ;;  %25 = vrot.lane.b32.xlu1 %v200_v3, %s262_s17  ;;  %4 = vst.msk [vmem:[#allocation0] sm:$0x1] %vm3_vm0, %v2_v10   ;;  %v207_v11 = vld [vmem:[%s399_s0 + $0x15] sm:$0x1]   ;;  %v208_v12 = vld [vmem:[%s399_s0 + $0x14] sm:$0x1]  }
   0x7   :  { %s269_s13 = smov 84   ;;  %s270_s14 = smov 80   ;;  %v209_v13 = vld [vmem:[%s399_s0 + $0x13] sm:$0x1]   ;;  %v210_v14 = vld [vmem:[%s399_s0 + $0x12] sm:$0x1]  }
   0x8   :  { %s271_s19 = smov 76   ;;  %s272_s20 = smov 72   ;;  %v211_v15 = vld [vmem:[%s399_s0 + $0x11] sm:$0x1]   ;;  %v212_v16 = vld [vmem:[%s399_s0 + $0x10] sm:$0x1]  }
   0x9   :  { %s273_s25 = smov 68   ;;  %s274_s26 = smov 64   ;;  %v213_v17 = vld [vmem:[%s399_s0 + $0xf] sm:$0x1]   ;;  %v214_v18 = vld [vmem:[%s399_s0 + $0xe] sm:$0x1]  }
   0xa   :  { %31 = vrot.lane.b32.xlu0 %v201_v4, %s263_s22  ;;  %37 = vrot.lane.b32.xlu1 %v202_v5, %s264_s23  ;;  %s275_s2 = smov 60   ;;  %s276_s3 = smov 56   ;;  %v215_v19 = vld [vmem:[%s399_s0 + $0xd] sm:$0x1]   ;;  %v216_v20 = vld [vmem:[%s399_s0 + $0xc] sm:$0x1]  }
   0xb   :  { %s278_s9 = smov 48   ;;  %v217_v21 = vld [vmem:[%s399_s0 + $0xb] sm:$0x1]   ;;  %v218_v22 = vld [vmem:[%s399_s0 + $0xa] sm:$0x1]   ;;  %s280_s15 = smov 40  }
   0xc   :  { %v219_v23 = vld [vmem:[%s399_s0 + $0x9] sm:$0x1]   ;;  %v220_v24 = vld [vmem:[%s399_s0 + $0x8] sm:$0x1]   ;;  %s282_s21 = smov 32   ;;  %s284_s27 = smov 24  }
   0xd   :  { %v221_v25 = vld [vmem:[%s399_s0 + $0x7] sm:$0x1]   ;;  %v222_v26 = vld [vmem:[%s399_s0 + $0x6] sm:$0x1]   ;;  %v223_v27 = vld [vmem:[%s399_s0 + $0x5] sm:$0x1]  }
   0xe   :  { %43 = vrot.lane.b32.xlu0 %v203_v6, %s265_s28  ;;  %49 = vrot.lane.b32.xlu1 %v204_v7, %s266_s29  ;;  %v224_v28 = vld [vmem:[%s399_s0 + $0x4] sm:$0x1]   ;;  %s286_s4 = smov 16   ;;  %v225_v29 = vld [vmem:[%s399_s0 + $0x3] sm:$0x1]   ;;  %s288_s10 = smov 8  }
   0xf   :  { %v226_v30 = vld [vmem:[%s399_s0 + $0x2] sm:$0x1]   ;;  %v227_v31 = vld [vmem:[%s399_s0 + $0x1] sm:$0x1]   ;;  %s289_s0 = smov 4   ;;  %vm27_vm4 = vcmask 950144  }
  0x10   :  { %vm33_vm5 = vcmask 917344   ;;  %vm39_vm6 = vcmask 884544   ;;  %vm45_vm7 = vcmask 851744   ;;  %vm51_vm8 = vcmask 818944  }
  0x11   :  { %vm57_vm9 = vcmask 786144   ;;  %vm63_vm10 = vcmask 753344   ;;  %vm69_vm11 = vcmask 720544   ;;  %vm75_vm12 = vcmask 687744  }
  0x12   :  { %55 = vrot.lane.b32.xlu0 %v205_v8, %s267_s7  ;;  %61 = vrot.lane.b32.xlu1 %v206_v9, %s268_s8  ;;  %s277_s8 = smov 52   ;;  %vm81_vm13 = vcmask 654944   ;;  %vm87_vm14 = vcmask 622144   ;;  %vm93_vm15 = vcmask 589344   ;;  %vm99_vm0 = vcmask 556544  }
  0x16   :  { %67 = vrot.lane.b32.xlu0 %v207_v11, %s269_s13  ;;  %73 = vrot.lane.b32.xlu1 %v208_v12, %s270_s14  ;;  %s279_s14 = smov 44  }
  0x1a   :  { %79 = vrot.lane.b32.xlu0 %v209_v13, %s271_s19  ;;  %85 = vrot.lane.b32.xlu1 %v210_v14, %s272_s20  ;;  %s281_s20 = smov 36  }
  0x1e   :  { %91 = vrot.lane.b32.xlu0 %v211_v15, %s273_s25  ;;  %97 = vrot.lane.b32.xlu1 %v212_v16, %s274_s26  ;;  %s283_s26 = smov 28  }
  0x22   :  { %103 = vrot.lane.b32.xlu0 %v213_v17, %s275_s2  ;;  %109 = vrot.lane.b32.xlu1 %v214_v18, %s276_s3  ;;  %s285_s3 = smov 20  }
  0x26   :  { %115 = vrot.lane.b32.xlu0 %v215_v19, %s277_s8  ;;  %121 = vrot.lane.b32.xlu1 %v216_v20, %s278_s9  ;;  %s287_s9 = smov 12  }
  0x2a   :  { %127 = vrot.lane.b32.xlu0 %v217_v21, %s279_s14  ;;  %133 = vrot.lane.b32.xlu1 %v218_v22, %s280_s15 }
  0x2e   :  { %139 = vrot.lane.b32.xlu0 %v219_v23, %s281_s20  ;;  %145 = vrot.lane.b32.xlu1 %v220_v24, %s282_s21 }
  0x32   :  { %151 = vrot.lane.b32.xlu0 %v221_v25, %s283_s26  ;;  %157 = vrot.lane.b32.xlu1 %v222_v26, %s284_s27 }
  0x36   :  { %163 = vrot.lane.b32.xlu0 %v223_v27, %s285_s3  ;;  %169 = vrot.lane.b32.xlu1 %v224_v28, %s286_s4 }
  0x3a   :  { %175 = vrot.lane.b32.xlu0 %v225_v29, %s287_s9  ;;  %181 = vrot.lane.b32.xlu1 %v226_v30, %s288_s10 }
  0x3e   :  { %187 = vrot.lane.b32.xlu0 %v227_v31, %s289_s0 }
  0x74   :  { %v8_v32 = vpop.permute.xlu0 %7   ;;  %v20_v33 = vpop.permute.xlu1 %19  }
  0x75   :  { %10 = vst.msk [vmem:[#allocation0] sm:$0x1] %vm9_vm1, %v8_v32   ;;  %vm105_vm1 = vcmask 523744  }
  0x78   :  { %v14_v34 = vpop.permute.xlu0 %13   ;;  %v26_v35 = vpop.permute.xlu1 %25  }
  0x79   :  { %16 = vst.msk [vmem:[#allocation0] sm:$0x1] %vm15_vm2, %v14_v34   ;;  %vm111_vm2 = vcmask 490944  }
  0x7a   :  { %22 = vst.msk [vmem:[#allocation0] sm:$0x1] %vm21_vm3, %v20_v33   ;;  %vm117_vm3 = vcmask 458144  }
  0x7b   :  { %28 = vst.msk [vmem:[#allocation0] sm:$0x1] %vm27_vm4, %v26_v35   ;;  %vm123_vm4 = vcmask 425344  }
  0x7c   :  { %v32_v36 = vpop.permute.xlu0 %31   ;;  %v38_v37 = vpop.permute.xlu1 %37  }
  0x7d   :  { %34 = vst.msk [vmem:[#allocation0] sm:$0x1] %vm33_vm5, %v32_v36   ;;  %vm129_vm5 = vcmask 392544  }
  0x7e   :  { %40 = vst.msk [vmem:[#allocation0] sm:$0x1] %vm39_vm6, %v38_v37   ;;  %vm135_vm6 = vcmask 359744  }
  0x80   :  { %v44_v38 = vpop.permute.xlu0 %43   ;;  %v50_v39 = vpop.permute.xlu1 %49  }
  0x81   :  { %46 = vst.msk [vmem:[#allocation0] sm:$0x1] %vm45_vm7, %v44_v38   ;;  %vm141_vm7 = vcmask 326944  }
  0x82   :  { %52 = vst.msk [vmem:[#allocation0] sm:$0x1] %vm51_vm8, %v50_v39   ;;  %vm147_vm8 = vcmask 294144  }
  0x84   :  { %v56_v40 = vpop.permute.xlu0 %55   ;;  %v62_v41 = vpop.permute.xlu1 %61  }
  0x85   :  { %58 = vst.msk [vmem:[#allocation0] sm:$0x1] %vm57_vm9, %v56_v40   ;;  %vm153_vm9 = vcmask 261344  }
  0x86   :  { %64 = vst.msk [vmem:[#allocation0] sm:$0x1] %vm63_vm10, %v62_v41   ;;  %vm159_vm10 = vcmask 228544  }
  0x88   :  { %v68_v42 = vpop.permute.xlu0 %67   ;;  %v74_v43 = vpop.permute.xlu1 %73  }
  0x89   :  { %70 = vst.msk [vmem:[#allocation0] sm:$0x1] %vm69_vm11, %v68_v42   ;;  %vm165_vm11 = vcmask 195744  }
  0x8a   :  { %76 = vst.msk [vmem:[#allocation0] sm:$0x1] %vm75_vm12, %v74_v43   ;;  %vm171_vm12 = vcmask 162944  }
  0x8c   :  { %v80_v44 = vpop.permute.xlu0 %79   ;;  %v86_v45 = vpop.permute.xlu1 %85  }
  0x8d   :  { %82 = vst.msk [vmem:[#allocation0] sm:$0x1] %vm81_vm13, %v80_v44   ;;  %vm177_vm13 = vcmask 130144  }
  0x8e   :  { %88 = vst.msk [vmem:[#allocation0] sm:$0x1] %vm87_vm14, %v86_v45   ;;  %vm183_vm14 = vcmask 97344  }
  0x90   :  { %v92_v46 = vpop.permute.xlu0 %91   ;;  %v98_v47 = vpop.permute.xlu1 %97  }
  0x91   :  { %94 = vst.msk [vmem:[#allocation0] sm:$0x1] %vm93_vm15, %v92_v46   ;;  %vm189_vm15 = vcmask 64544  }
  0x92   :  { %100 = vst.msk [vmem:[#allocation0] sm:$0x1] %vm99_vm0, %v98_v47  }
  0x94   :  { %v104_v48 = vpop.permute.xlu0 %103   ;;  %v110_v49 = vpop.permute.xlu1 %109  }
  0x95   :  { %106 = vst.msk [vmem:[#allocation0] sm:$0x1] %vm105_vm1, %v104_v48  }
  0x96   :  { %112 = vst.msk [vmem:[#allocation0] sm:$0x1] %vm111_vm2, %v110_v49  }
  0x98   :  { %v116_v50 = vpop.permute.xlu0 %115   ;;  %v122_v51 = vpop.permute.xlu1 %121  }
  0x99   :  { %118 = vst.msk [vmem:[#allocation0] sm:$0x1] %vm117_vm3, %v116_v50  }
  0x9a   :  { %124 = vst.msk [vmem:[#allocation0] sm:$0x1] %vm123_vm4, %v122_v51  }
  0x9c   :  { %v128_v52 = vpop.permute.xlu0 %127   ;;  %v134_v53 = vpop.permute.xlu1 %133  }
  0x9d   :  { %130 = vst.msk [vmem:[#allocation0] sm:$0x1] %vm129_vm5, %v128_v52  }
  0x9e   :  { %136 = vst.msk [vmem:[#allocation0] sm:$0x1] %vm135_vm6, %v134_v53  }
  0xa0   :  { %v140_v54 = vpop.permute.xlu0 %139   ;;  %v146_v55 = vpop.permute.xlu1 %145  }
  0xa1   :  { %142 = vst.msk [vmem:[#allocation0] sm:$0x1] %vm141_vm7, %v140_v54  }
  0xa2   :  { %148 = vst.msk [vmem:[#allocation0] sm:$0x1] %vm147_vm8, %v146_v55  }
  0xa4   :  { %v152_v56 = vpop.permute.xlu0 %151   ;;  %v158_v57 = vpop.permute.xlu1 %157  }
  0xa5   :  { %154 = vst.msk [vmem:[#allocation0] sm:$0x1] %vm153_vm9, %v152_v56  }
  0xa6   :  { %160 = vst.msk [vmem:[#allocation0] sm:$0x1] %vm159_vm10, %v158_v57  }
  0xa8   :  { %v164_v58 = vpop.permute.xlu0 %163   ;;  %v170_v59 = vpop.permute.xlu1 %169  }
  0xa9   :  { %166 = vst.msk [vmem:[#allocation0] sm:$0x1] %vm165_vm11, %v164_v58  }
  0xaa   :  { %172 = vst.msk [vmem:[#allocation0] sm:$0x1] %vm171_vm12, %v170_v59  }
  0xac   :  { %v176_v60 = vpop.permute.xlu0 %175   ;;  %v182_v61 = vpop.permute.xlu1 %181  }
  0xad   :  { %178 = vst.msk [vmem:[#allocation0] sm:$0x1] %vm177_vm13, %v176_v60  }
  0xae   :  { %184 = vst.msk [vmem:[#allocation0] sm:$0x1] %vm183_vm14, %v182_v61  }
  0xb0   :  { %v188_v62 = vpop.permute.xlu0 %187  }
  0xb1   :  { %190 = vst.msk [vmem:[#allocation0] sm:$0x1] %vm189_vm15, %v188_v62  }
  0xb8   :  { %v194_v63 = vld [vmem:[#allocation0] sm:$0x1] }
  0xb9   :  { %196 = vst [vmem:[%s400_s1] sm:$0x1] %v194_v63 }

// kernel: sepconv_freq.2
= control target key start
LH: loop header
LB: loop body
LE: loop exit
PB: predicated region body
PF: predicated region fallthrough
CT: control target
= control target key end

     0   :  { %vm40_vm0 = vcmask 1046528   ;;  %vm61_vm1 = vcmask 1045504   ;;  %vm178_vm2 = vcmask 1040384   ;;  %s366_s2 = inlined_call_operand.vmem [shape: f32[128,128], index: 2, kind: input, shape index: {}]   ;;  %s367_s0 = inlined_call_operand.vmem [shape: f32[1,18,128], index: 0, kind: input, shape index: {}]   ;;  %s368_s1 = inlined_call_operand.vmem [shape: f32[3,128], index: 1, kind: input, shape index: {}]   ;;  %s369_s3 = inlined_call_operand.vmem [shape: f32[1,2,128], index: 3, kind: output, shape index: {}]  }
   0x1   :  { %v71_v0 = vld [vmem:[%s366_s2] sm:$0xff]  ;;  %v72_v1 = vld [vmem:[%s366_s2 + $0x8] sm:$0xff]  ;;  %v73_v2 = vld [vmem:[%s366_s2 + $0x10] sm:$0xff] }
   0x2   :  { %v241_v3 = vpack.c.bf16 %v72_v1, %v71_v0  ;;  %v74_v4 = vld [vmem:[%s366_s2 + $0x18] sm:$0xff]  ;;  %v75_v6 = vld [vmem:[%s366_s2 + $0x20] sm:$0xff]  ;;  %v76_v7 = vld [vmem:[%s366_s2 + $0x28] sm:$0xff] }
   0x3   :  { %v245_v5 = vpack.c.bf16 %v74_v4, %v73_v2  ;;  %v249_v8 = vpack.c.bf16 %v76_v7, %v75_v6  ;;  %v14_v9 = vld [vmem:[%s367_s0] sm:$0xff]  ;;  %v15_v10 = vld [vmem:[%s367_s0 + $0x8] sm:$0xff]  ;;  %v77_v11 = vld [vmem:[%s366_s2 + $0x30] sm:$0xff] }
   0x4   :  { %242 = vmatprep.subr.bf16.mxu0 %v241_v3  ;;  %v78_v12 = vld [vmem:[%s366_s2 + $0x38] sm:$0xff]  ;;  %v17_v13 = vmax.f32 %v14_v9, 0.0  ;;  %v18_v14 = vmax.f32 %v15_v10, 0.0  ;;  %v185_v15 = vld [vmem:[%s368_s1] ss:$0 sm:$0xff]  ;;  %v80_v26 = vld [vmem:[%s366_s2 + $0x48] sm:$0xff] }
   0x5   :  { %244 = vmatpush3.bf16.msra.mxu0 %v241_v3  ;;  %v186_v16 = vld [vmem:[%s368_s1 + $0x1] ss:$0 sm:$0xff]  ;;  %v187_v17 = vld [vmem:[%s368_s1 + $0x2] ss:$0 sm:$0xff]  ;;  %v253_v20 = vpack.c.bf16 %v78_v12, %v77_v11  ;;  %v16_v21 = vld [vmem:[%s367_s0 + $0x10] sm:$0x3] }
   0x6   :  { %246 = vmatprep.subr.bf16.mxu0 %v245_v5  ;;  %v34_v18 = vmul.f32 %v186_v16, %v17_v13  ;;  %v35_v19 = vmul.f32 %v186_v16, %v18_v14  ;;  %v25_v22 = vmul.f32 %v185_v15, %v17_v13  ;;  %v55_v23 = vmul.f32 %v187_v17, %v17_v13  ;;  %v79_v25 = vld [vmem:[%s366_s2 + $0x40] sm:$0xff]  ;;  %v81_v36 = vld [vmem:[%s366_s2 + $0x50] sm:$0xff]  ;;  %v82_v37 = vld [vmem:[%s366_s2 + $0x58] sm:$0xff] }
   0x7   :  { %v56_v24 = vmul.f32 %v187_v17, %v18_v14  ;;  %v19_v31 = vmax.f32 %v16_v21, 0.0  ;;  %v257_v33 = vpack.c.bf16 %v80_v26, %v79_v25  ;;  %v261_v40 = vpack.c.bf16 %v82_v37, %v81_v36  ;;  %v83_v41 = vld [vmem:[%s366_s2 + $0x60] sm:$0xff]  ;;  %v84_v42 = vld [vmem:[%s366_s2 + $0x68] sm:$0xff]  ;;  %v85_v46 = vld [vmem:[%s366_s2 + $0x70] sm:$0xff] }
   0x8   :  { %v41_v27 = vrot.slane %v34_v18, 1  ;;  %v42_v28 = vrot.slane %v35_v19, 1  ;;  %v62_v29 = vrot.slane %v55_v23, 2  ;;  %v265_v45 = vpack.c.bf16 %v84_v42, %v83_v41  ;;  %v86_v47 = vld [vmem:[%s366_s2 + $0x78] sm:$0xff] }
   0x9   :  { %248 = vmatpush3.bf16.msra.mxu0 %v245_v5  ;;  %v63_v30 = vrot.slane %v56_v24, 2  ;;  %v36_v39 = vmul.f32 %v186_v16, %v19_v31  ;;  %v57_v44 = vmul.f32 %v187_v17, %v19_v31  ;;  %v26_v48 = vmul.f32 %v185_v15, %v18_v14 }
   0xa   :  { %250 = vmatprep.subr.bf16.mxu0 %v249_v8  ;;  %v43_v32 = vsel %vm40_vm0, %v41_v27, %v42_v28  ;;  %v269_v51 = vpack.c.bf16 %v86_v47, %v85_v46 }
   0xb   :  { %v48_v34 = vadd.f32 %v43_v32, %v25_v22  ;;  %v64_v35 = vsel %vm61_vm1, %v62_v29, %v63_v30  ;;  %v44_v43 = vrot.slane %v36_v39, 1  ;;  %v65_v50 = vrot.slane %v57_v44, 2 }
   0xd   :  { %252 = vmatpush3.bf16.msra.mxu0 %v249_v8  ;;  %v69_v38 = vadd.f32 %v64_v35, %v48_v34  ;;  %v45_v49 = vsel %vm40_vm0, %v42_v28, %v44_v43  ;;  %v66_v53 = vsel %vm61_vm1, %v63_v30, %v65_v50 }
   0xe   :  { %254 = vmatprep.subr.bf16.mxu0 %v253_v20  ;;  %v49_v52 = vadd.f32 %v45_v49, %v26_v48 }
   0xf   :  { %238 = vmatprep.mubr.f32.mxu0 %v69_v38 }
  0x10   :  { %v70_v54 = vadd.f32 %v66_v53, %v49_v52 }
  0x11   :  { %256 = vmatpush3.bf16.msra.mxu0 %v253_v20 }
  0x12   :  { %258 = vmatprep.subr.bf16.mxu0 %v257_v33 }
  0x15   :  { %260 = vmatpush3.bf16.msra.mxu0 %v257_v33 }
  0x16   :  { %262 = vmatprep.subr.bf16.mxu0 %v261_v40 }
  0x19   :  { %264 = vmatpush3.bf16.msra.mxu0 %v261_v40 }
  0x1a   :  { %266 = vmatprep.subr.bf16.mxu0 %v265_v45 }
  0x1d   :  { %268 = vmatpush3.bf16.msra.mxu0 %v265_v45 }
  0x1e   :  { %270 = vmatprep.subr.bf16.mxu0 %v269_v51 }
  0x21   :  { %272 = vmatpush3.bf16.msra.mxu0 %v269_v51 }
  0x24   :  { %239 = vmatmul.mubr.f32.vlgmr.msra.gmra.mrb[0].mxu0 %v70_v54 }
  0xf7   :  { %v240_v55 = vpop.f32.mrb[0].mxu0 }
  0xf8   :  { %v170_v56 = vmul.f32 %v240_v55, %v240_v55  ;;  %v153_v57 = vpop.f32.mrb[1].mxu0 }
  0xf9   :  { %v162_v58 = vadd.f32 %v240_v55, %v153_v57  ;;  %v169_v59 = vmul.f32 %v153_v57, %v153_v57 }
  0xfb   :  { %v163_v60 = vrot.slane %v162_v58, 4  ;;  %v171_v61 = vadd.f32 %v170_v56, %v169_v59 }
  0xfd   :  { %v164_v62 = vadd.f32 %v163_v60, %v162_v58  ;;  %v172_v63 = vrot.slane %v171_v61, 4 }
  0xff   :  { %v165_v0 = vrot.slane %v164_v62, 2  ;;  %v173_v1 = vadd.f32 %v172_v63, %v171_v61 }
 0x101   :  { %v166_v2 = vadd.f32 %v165_v0, %v164_v62  ;;  %v174_v3 = vrot.slane %v173_v1, 2 }
 0x103   :  { %v167_v4 = vrot.slane %v166_v2, 1  ;;  %v175_v5 = vadd.f32 %v174_v3, %v173_v1 }
 0x105   :  { %v176_v6 = vrot.slane %v175_v5, 1  ;;  %v168_v7 = vadd.f32 %v167_v4, %v166_v2 }
 0x107   :  { %v177_v8 = vadd.f32 %v176_v6, %v175_v5 }
 0x109   :  { %v179_v9 = vsel %vm178_vm2, %v168_v7, %v177_v8 }
 0x10a   :  { %180 = vst [vmem:[%s369_s3] sm:$0x3] %v179_v9 }

// kernel: sepconv_freq.3
= control target key start
LH: loop header
LB: loop body
LE: loop exit
PB: predicated region body
PF: predicated region fallthrough
CT: control target
= control target key end

     0   :  { %vm57_vm0 = vcmask 1046528   ;;  %vm78_vm1 = vcmask 1045504   ;;  %vm210_vm2 = vcmask 1040384   ;;  %s834_s5 = inlined_call_operand.vmem [shape: f32[128,128], index: 5, kind: input, shape index: {}]   ;;  %s835_s0 = inlined_call_operand.vmem [shape: f32[1,18,128], index: 0, kind: input, shape index: {}]   ;;  %s836_s4 = inlined_call_operand.vmem [shape: f32[3,128], index: 4, kind: input, shape index: {}]   ;;  %s837_s7 = inlined_call_operand.vmem [shape: f32[128,256], index: 7, kind: input, shape index: {}]   ;;  %s838_s2 = inlined_call_operand.vmem [shape: f32[1,128], index: 2, kind: input, shape index: {}]   ;;  %s839_s3 = inlined_call_operand.vmem [shape: f32[1,128], index: 3, kind: input, shape index: {}]   ;;  %s840_s1 = inlined_call_operand.vmem [shape: f32[1,1,128], index: 1, kind: input, shape index: {}]   ;;  %s841_s6 = inlined_call_operand.vmem [shape: f32[3,128], index: 6, kind: input, shape index: {}]   ;;  %s842_s8 = inlined_call_operand.vmem [shape: f32[1,16,256], index: 8, kind: output, shape index: {0}]   ;;  %s843_s9 = inlined_call_operand.vmem [shape: f32[1,2,256], index: 9, kind: output, shape index: {1}]  }
   0x1   :  { %v88_v0 = vld [vmem:[%s834_s5] sm:$0xff]  ;;  %v89_v1 = vld [vmem:[%s834_s5 + $0x8] sm:$0xff]  ;;  %v90_v2 = vld [vmem:[%s834_s5 + $0x10] sm:$0xff] }
   0x2   :  { %v498_v3 = vpack.c.bf16 %v89_v1, %v88_v0  ;;  %v91_v4 = vld [vmem:[%s834_s5 + $0x18] sm:$0xff]  ;;  %v92_v6 = vld [vmem:[%s834_s5 + $0x20] sm:$0xff]  ;;  %v93_v7 = vld [vmem:[%s834_s5 + $0x28] sm:$0xff] }
   0x3   :  { %v502_v5 = vpack.c.bf16 %v91_v4, %v90_v2  ;;  %v506_v8 = vpack.c.bf16 %v93_v7, %v92_v6  ;;  %v31_v9 = vld [vmem:[%s835_s0] sm:$0xff]  ;;  %v32_v10 = vld [vmem:[%s835_s0 + $0x8] sm:$0xff]  ;;  %v94_v11 = vld [vmem:[%s834_s5 + $0x30] sm:$0xff] }
   0x4   :  { %499 = vmatprep.subr.bf16.mxu0 %v498_v3  ;;  %v95_v12 = vld [vmem:[%s834_s5 + $0x38] sm:$0xff]  ;;  %v34_v13 = vmax.f32 %v31_v9, 0.0  ;;  %v644_v14 = vmax.f32 %v32_v10, 0.0  ;;  %v649_v15 = vld [vmem:[%s836_s4] ss:$0 sm:$0xff]  ;;  %v269_v18 = vld [vmem:[%s837_s7 + $0x8] sm:$0xff] }
   0x5   :  { %501 = vmatpush3.bf16.msra.mxu0 %v498_v3  ;;  %v436_v16 = vld [vmem:[%s836_s4 + $0x1] ss:$0 sm:$0xff]  ;;  %v437_v17 = vld [vmem:[%s836_s4 + $0x2] ss:$0 sm:$0xff]  ;;  %v271_v21 = vld [vmem:[%s837_s7 + $0x18] sm:$0xff]  ;;  %v510_v24 = vpack.c.bf16 %v95_v12, %v94_v11 }
   0x6   :  { %503 = vmatprep.subr.bf16.mxu0 %v502_v5  ;;  %v51_v19 = vmul.f32 %v436_v16, %v34_v13  ;;  %v661_v20 = vmul.f32 %v436_v16, %v644_v14  ;;  %v268_v22 = vld [vmem:[%s837_s7] sm:$0xff]  ;;  %v270_v23 = vld [vmem:[%s837_s7 + $0x10] sm:$0xff]  ;;  %v42_v26 = vmul.f32 %v649_v15, %v34_v13  ;;  %v72_v27 = vmul.f32 %v437_v17, %v34_v13  ;;  %v273_v29 = vld [vmem:[%s837_s7 + $0x28] sm:$0xff] }
   0x7   :  { %v33_v25 = vld [vmem:[%s835_s0 + $0x10] sm:$0x3]  ;;  %v73_v28 = vmul.f32 %v437_v17, %v644_v14  ;;  %v275_v30 = vld [vmem:[%s837_s7 + $0x38] sm:$0xff]  ;;  %v96_v31 = vld [vmem:[%s834_s5 + $0x40] sm:$0xff]  ;;  %v530_v35 = vpack.c.bf16 %v271_v21, %v269_v18  ;;  %v532_v36 = vpack.c.bf16 %v270_v23, %v268_v22  ;;  %v43_v2 = vmul.f32 %v649_v15, %v644_v14 }
   0x8   :  { %v97_v32 = vld [vmem:[%s834_s5 + $0x48] sm:$0xff]  ;;  %v58_v33 = vrot.slane %v51_v19, 1  ;;  %v59_v34 = vrot.slane %v661_v20, 1  ;;  %v79_v37 = vrot.slane %v72_v27, 2  ;;  %v272_v39 = vld [vmem:[%s837_s7 + $0x20] sm:$0xff]  ;;  %v274_v40 = vld [vmem:[%s837_s7 + $0x30] sm:$0xff]  ;;  %v534_v43 = vpack.c.bf16 %v275_v30, %v273_v29 }
   0x9   :  { %505 = vmatpush3.bf16.msra.mxu0 %v502_v5  ;;  %v80_v38 = vrot.slane %v73_v28, 2  ;;  %v36_v41 = vmax.f32 %v33_v25, 0.0  ;;  %531 = vmatprep.subr.bf16.mxu1 %v530_v35  ;;  %v277_v44 = vld [vmem:[%s837_s7 + $0x48] sm:$0xff]  ;;  %v279_v45 = vld [vmem:[%s837_s7 + $0x58] sm:$0xff]  ;;  %v514_v46 = vpack.c.bf16 %v97_v32, %v96_v31  ;;  %v98_v49 = vld [vmem:[%s834_s5 + $0x50] sm:$0xff]  ;;  %v536_v51 = vpack.c.bf16 %v274_v40, %v272_v39 }
   0xa   :  { %507 = vmatprep.subr.bf16.mxu0 %v506_v8  ;;  %v60_v42 = vsel %vm57_vm0, %v58_v33, %v59_v34  ;;  %v99_v50 = vld [vmem:[%s834_s5 + $0x58] sm:$0xff]  ;;  %533 = vmatpush1.bf16.msra.mxu1 %v532_v36  ;;  %v538_v53 = vpack.c.bf16 %v279_v45, %v277_v44  ;;  %v276_v54 = vld [vmem:[%s837_s7 + $0x40] sm:$0xff]  ;;  %v278_v55 = vld [vmem:[%s837_s7 + $0x50] sm:$0xff] }
   0xb   :  { %v65_v47 = vadd.f32 %v60_v42, %v42_v26  ;;  %v81_v48 = vsel %vm78_vm1, %v79_v37, %v80_v38  ;;  %535 = vmatprep.subr.bf16.mxu1 %v534_v43  ;;  %v53_v56 = vmul.f32 %v436_v16, %v36_v41  ;;  %v518_v57 = vpack.c.bf16 %v99_v50, %v98_v49  ;;  %v100_v58 = vld [vmem:[%s834_s5 + $0x60] sm:$0xff]  ;;  %v101_v59 = vld [vmem:[%s834_s5 + $0x68] sm:$0xff]  ;;  %v102_v0 = vld [vmem:[%s834_s5 + $0x70] sm:$0xff] }
   0xc   :  { %v540_v60 = vpack.c.bf16 %v278_v55, %v276_v54  ;;  %v74_v62 = vmul.f32 %v437_v17, %v36_v41  ;;  %v522_v63 = vpack.c.bf16 %v101_v59, %v100_v58  ;;  %v103_v1 = vld [vmem:[%s834_s5 + $0x78] sm:$0xff]  ;;  %v281_v9 = vld [vmem:[%s837_s7 + $0x68] sm:$0xff]  ;;  %v280_v12 = vld [vmem:[%s837_s7 + $0x60] sm:$0xff] }
   0xd   :  { %509 = vmatpush3.bf16.msra.mxu0 %v506_v8  ;;  %v86_v52 = vadd.f32 %v81_v48, %v65_v47  ;;  %v61_v61 = vrot.slane %v53_v56, 1  ;;  %v526_v5 = vpack.c.bf16 %v103_v1, %v102_v0  ;;  %v283_v10 = vld [vmem:[%s837_s7 + $0x78] sm:$0xff]  ;;  %v282_v13 = vld [vmem:[%s837_s7 + $0x70] sm:$0xff]  ;;  %v285_v15 = vld [vmem:[%s837_s7 + $0x88] sm:$0xff] }
   0xe   :  { %511 = vmatprep.subr.bf16.mxu0 %v510_v24  ;;  %537 = vmatpush1.bf16.msra.mxu1 %v536_v51  ;;  %v82_v4 = vrot.slane %v74_v62, 2  ;;  %v542_v11 = vpack.c.bf16 %v283_v10, %v281_v9  ;;  %v544_v14 = vpack.c.bf16 %v282_v13, %v280_v12  ;;  %v287_v16 = vld [vmem:[%s837_s7 + $0x98] sm:$0xff]  ;;  %v284_v18 = vld [vmem:[%s837_s7 + $0x80] sm:$0xff]  ;;  %v286_v19 = vld [vmem:[%s837_s7 + $0x90] sm:$0xff] }
   0xf   :  { %495 = vmatprep.mubr.f32.mxu0 %v86_v52  ;;  %539 = vmatprep.subr.bf16.mxu1 %v538_v53  ;;  %v62_v3 = vsel %vm57_vm0, %v59_v34, %v61_v61  ;;  %v546_v17 = vpack.c.bf16 %v287_v16, %v285_v15  ;;  %v548_v20 = vpack.c.bf16 %v286_v19, %v284_v18  ;;  %v289_v21 = vld [vmem:[%s837_s7 + $0xa8] sm:$0xff]  ;;  %v291_v22 = vld [vmem:[%s837_s7 + $0xb8] sm:$0xff]  ;;  %v290_v25 = vld [vmem:[%s837_s7 + $0xb0] sm:$0xff] }
  0x10   :  { %v66_v6 = vadd.f32 %v62_v3, %v43_v2  ;;  %v83_v7 = vsel %vm78_vm1, %v80_v38, %v82_v4  ;;  %v550_v23 = vpack.c.bf16 %v291_v22, %v289_v21  ;;  %v293_v27 = vld [vmem:[%s837_s7 + $0xc8] sm:$0xff]  ;;  %v295_v28 = vld [vmem:[%s837_s7 + $0xd8] sm:$0xff]  ;;  %v292_v29 = vld [vmem:[%s837_s7 + $0xc0] sm:$0xff]  ;;  %v563_v38 = vmov 0.0  }
  0x11   :  { %513 = vmatpush3.bf16.msra.mxu0 %v510_v24  ;;  %v288_v24 = vld [vmem:[%s837_s7 + $0xa0] sm:$0xff]  ;;  %v294_v30 = vld [vmem:[%s837_s7 + $0xd0] sm:$0xff]  ;;  %v554_v31 = vpack.c.bf16 %v295_v28, %v293_v27  ;;  %v297_v33 = vld [vmem:[%s837_s7 + $0xe8] sm:$0xff]  ;;  %364 = vmatprep.mubr.f32.mxu1 %v563_v38 }
  0x12   :  { %515 = vmatprep.subr.bf16.mxu0 %v514_v46  ;;  %541 = vmatpush1.bf16.msra.mxu1 %v540_v60  ;;  %v87_v8 = vadd.f32 %v83_v7, %v66_v6  ;;  %v552_v26 = vpack.c.bf16 %v290_v25, %v288_v24  ;;  %v556_v32 = vpack.c.bf16 %v294_v30, %v292_v29  ;;  %v299_v34 = vld [vmem:[%s837_s7 + $0xf8] sm:$0xff]  ;;  %v296_v35 = vld [vmem:[%s837_s7 + $0xe0] sm:$0xff]  ;;  %v298_v37 = vld [vmem:[%s837_s7 + $0xf0] sm:$0xff] }
  0x13   :  { %543 = vmatprep.subr.bf16.mxu1 %v542_v11  ;;  %v558_v36 = vpack.c.bf16 %v299_v34, %v297_v33  ;;  %v560_v39 = vpack.c.bf16 %v298_v37, %v296_v35  ;;  %v438_v40 = vld [vmem:[%s838_s2] ss:$0 sm:$0xff]  ;;  %v442_v54 = vld [vmem:[%s841_s6 + $0x1] ss:$0 sm:$0xff]  ;;  %v443_v55 = vld [vmem:[%s841_s6 + $0x2] ss:$0 sm:$0xff] }
  0x14   :  { %v439_v42 = vld [vmem:[%s839_s3] ss:$0 sm:$0xff] }
  0x15   :  { %517 = vmatpush3.bf16.msra.mxu0 %v514_v46  ;;  %v440_v47 = vld [vmem:[%s840_s1] ss:$0 sm:$0xff] }
  0x16   :  { %519 = vmatprep.subr.bf16.mxu0 %v518_v57  ;;  %545 = vmatpush1.bf16.msra.mxu1 %v544_v14  ;;  %v441_v0 = vld [vmem:[%s841_s6] ss:$0 sm:$0xff] }
  0x17   :  { %547 = vmatprep.subr.bf16.mxu1 %v546_v17 }
  0x19   :  { %521 = vmatpush3.bf16.msra.mxu0 %v518_v57 }
  0x1a   :  { %523 = vmatprep.subr.bf16.mxu0 %v522_v63  ;;  %549 = vmatpush1.bf16.msra.mxu1 %v548_v20 }
  0x1b   :  { %551 = vmatprep.subr.bf16.mxu1 %v550_v23 }
  0x1d   :  { %525 = vmatpush3.bf16.msra.mxu0 %v522_v63 }
  0x1e   :  { %527 = vmatprep.subr.bf16.mxu0 %v526_v5  ;;  %553 = vmatpush1.bf16.msra.mxu1 %v552_v26 }
  0x1f   :  { %555 = vmatprep.subr.bf16.mxu1 %v554_v31 }
  0x21   :  { %529 = vmatpush3.bf16.msra.mxu0 %v526_v5 }
  0x22   :  { %557 = vmatpush1.bf16.msra.mxu1 %v556_v32 }
  0x23   :  { %559 = vmatprep.subr.bf16.mxu1 %v558_v36 }
  0x24   :  { %496 = vmatmul.mubr.f32.vlgmr.msra.gmra.mrb[0].mxu0 %v87_v8 }
  0x26   :  { %561 = vmatpush1.bf16.msra.mxu1 %v560_v39 }
  0xf7   :  { %v497_v41 = vpop.f32.mrb[0].mxu0 }
  0xf8   :  { %v187_v43 = vmul.f32 %v497_v41, %v438_v40  ;;  %v170_v44 = vpop.f32.mrb[1].mxu0 }
  0xf9   :  { %v186_v45 = vmul.f32 %v438_v40, %v170_v44 }
  0xfa   :  { %v196_v46 = vadd.f32 %v439_v42, %v187_v43 }
  0xfb   :  { %v195_v48 = vadd.f32 %v439_v42, %v186_v45 }
  0xfc   :  { %v198_v49 = vmax.f32 %v196_v46, 0.0 }
  0xfd   :  { %v197_v50 = vmax.f32 %v195_v48, 0.0 }
  0xfe   :  { %v207_v51 = vmul.f32 %v440_v47, %v198_v49 }
  0xff   :  { %v206_v52 = vmul.f32 %v440_v47, %v197_v50 }
 0x100   :  { %v212_v53 = vrot.slane %v207_v51, 7 }
 0x101   :  { %v211_v56 = vrot.slane %v206_v52, 7 }
 0x102   :  { %v218_v57 = vsel %vm210_vm2, %v212_v53, 0.0 }
 0x103   :  { %v235_v58 = vmul.f32 %v442_v54, %v218_v57  ;;  %v255_v59 = vmul.f32 %v443_v55, %v218_v57  ;;  %v213_v60 = vsel %vm210_vm2, %v211_v56, %v212_v53  ;;  %v217_v61 = vsel %vm210_vm2, 0.0, %v211_v56 }
 0x104   :  { %v233_v62 = vmul.f32 %v442_v54, %v217_v61  ;;  %v253_v63 = vmul.f32 %v443_v55, %v217_v61  ;;  %v234_v1 = vmul.f32 %v442_v54, %v213_v60  ;;  %v254_v4 = vmul.f32 %v443_v55, %v213_v60 }
 0x105   :  { %v242_v2 = vrot.slane %v235_v58, 1  ;;  %v262_v3 = vrot.slane %v255_v59, 2  ;;  %v224_v8 = vmul.f32 %v441_v0, %v217_v61  ;;  %v225_v10 = vmul.f32 %v441_v0, %v213_v60 }
 0x106   :  { %v239_v5 = vrot.slane %v233_v62, 1  ;;  %v240_v6 = vrot.slane %v234_v1, 1  ;;  %v259_v7 = vrot.slane %v253_v63, 2  ;;  %v260_v9 = vrot.slane %v254_v4, 2 }
 0x108   :  { %v241_v11 = vsel %vm57_vm0, %v239_v5, %v240_v6  ;;  %v243_v12 = vsel %vm57_vm0, %v240_v6, %v242_v2  ;;  %v261_v14 = vsel %vm78_vm1, %v259_v7, %v260_v9  ;;  %v263_v16 = vsel %vm78_vm1, %v260_v9, %v262_v3 }
 0x109   :  { %v246_v13 = vadd.f32 %v241_v11, %v224_v8  ;;  %v247_v15 = vadd.f32 %v243_v12, %v225_v10 }
 0x10b   :  { %v266_v17 = vadd.f32 %v261_v14, %v246_v13  ;;  %v267_v18 = vadd.f32 %v263_v16, %v247_v15 }
 0x10d   :  { %365 = vmatmul.mubr.f32.vlgmr.msra.gmra.mrb[0].mxu1 %v266_v17 }
 0x10e   :  { %370 = vmatprep.mubr.f32.mxu1 %v563_v38 }
 0x111   :  { %371 = vmatmul.mubr.f32.gmra.mrb[2].mxu1 %v267_v18 }
 0x1e0   :  { %v366_v19 = vpop.f32.mrb[0].mxu1 }
 0x1e1   :  { %423 = vst [vmem:[%s842_s8] sm:$0xff] %v366_v19  ;;  %v368_v20 = vpop.f32.mrb[1].mxu1  ;;  %v391_v22 = vmul.f32 %v366_v19, %v366_v19 }
 0x1e2   :  { %424 = vst [vmem:[%s842_s8 + $0x8] sm:$0xff] %v368_v20  ;;  %v392_v26 = vmul.f32 %v368_v20, %v368_v20 }
 0x1e4   :  { %v372_v21 = vpop.f32.mrb[2].mxu1 }
 0x1e5   :  { %v377_v23 = vadd.f32 %v372_v21, %v366_v19  ;;  %v393_v24 = vmul.f32 %v372_v21, %v372_v21  ;;  %425 = vst [vmem:[%s842_s8 + $0x10] sm:$0xff] %v372_v21  ;;  %v374_v25 = vpop.f32.mrb[3].mxu1 }
 0x1e6   :  { %v384_v27 = vadd.f32 %v374_v25, %v368_v20  ;;  %v394_v28 = vmul.f32 %v374_v25, %v374_v25  ;;  %426 = vst [vmem:[%s842_s8 + $0x18] sm:$0xff] %v374_v25 }
 0x1e7   :  { %v378_v29 = vrot.slane %v377_v23, 4  ;;  %v395_v30 = vadd.f32 %v393_v24, %v391_v22 }
 0x1e8   :  { %v385_v31 = vrot.slane %v384_v27, 4  ;;  %v402_v32 = vadd.f32 %v394_v28, %v392_v26 }
 0x1e9   :  { %v379_v33 = vadd.f32 %v378_v29, %v377_v23  ;;  %v396_v34 = vrot.slane %v395_v30, 4 }
 0x1ea   :  { %v386_v35 = vadd.f32 %v385_v31, %v384_v27  ;;  %v403_v36 = vrot.slane %v402_v32, 4 }
 0x1eb   :  { %v380_v37 = vrot.slane %v379_v33, 2  ;;  %v397_v38 = vadd.f32 %v396_v34, %v395_v30 }
 0x1ec   :  { %v387_v39 = vrot.slane %v386_v35, 2  ;;  %v404_v40 = vadd.f32 %v403_v36, %v402_v32 }
 0x1ed   :  { %v381_v41 = vadd.f32 %v380_v37, %v379_v33  ;;  %v398_v42 = vrot.slane %v397_v38, 2 }
 0x1ee   :  { %v388_v43 = vadd.f32 %v387_v39, %v386_v35  ;;  %v405_v44 = vrot.slane %v404_v40, 2 }
 0x1ef   :  { %v382_v45 = vrot.slane %v381_v41, 1  ;;  %v399_v46 = vadd.f32 %v398_v42, %v397_v38 }
 0x1f0   :  { %v389_v47 = vrot.slane %v388_v43, 1  ;;  %v406_v48 = vadd.f32 %v405_v44, %v404_v40 }
 0x1f1   :  { %v400_v49 = vrot.slane %v399_v46, 1  ;;  %v383_v51 = vadd.f32 %v382_v45, %v381_v41 }
 0x1f2   :  { %v407_v50 = vrot.slane %v406_v48, 1  ;;  %v390_v53 = vadd.f32 %v389_v47, %v388_v43 }
 0x1f3   :  { %v401_v52 = vadd.f32 %v400_v49, %v399_v46 }
 0x1f4   :  { %v408_v54 = vadd.f32 %v407_v50, %v406_v48 }
 0x1f5   :  { %v409_v55 = vsel %vm210_vm2, %v383_v51, %v401_v52 }
 0x1f6   :  { %v410_v56 = vsel %vm210_vm2, %v390_v53, %v408_v54 }
 0x1f7   :  { %v413_v57 = vcombine.low %v409_v55, %v410_v56 }
 0x1f9   :  { %444 = vst.sshfl [vmem:[%s843_s9] sm:$0x33 pattern:$0x76325410] %v413_v57 }

</bundles_post_ra>
